<compile_context>
chip_gen: v7x
topology: tpu7x:2x2x1
jax: 0.10.0
libtpu: 0.0.40
codegen_flags: <defaults>
</compile_context>

<pallas_src>
import functools

import jax
import jax.numpy as jnp
import numpy as np
from jax.experimental import pallas as pl
from jax.experimental.pallas import tpu as pltpu


def _ru(n, m):
    return ((n + m - 1) // m) * m


def _pick_group(batch, n_nodes, target_rows=256):
    """Pick graphs-per-step G: G*N ~= target_rows, B % G == 0, grid >= 2 if possible."""
    g = max(1, min(batch, target_rows // max(n_nodes, 1)))
    while batch % g != 0:
        g -= 1
    if batch // g < 2 and batch >= 2:      # keep >= 2 grid steps for v7x's 2 TCs
        g = max(1, batch // 2)
        while batch % g != 0:
            g -= 1
    return g


def pack_params(p, in_dim, in_p, hidden, n_classes, hp):
    """Pack all weights/biases into one (rows, hp) bf16 slab, zero padded.

    Zero padding keeps every padded lane of every intermediate exactly zero.
    All segment offsets are multiples of 8 (sublane aligned static slices).
    """
    seg_rows = [("w1", in_p), ("b1", 8), ("w2", hp), ("b2", 8),
                ("wc1", hp), ("bc1", 8), ("wc2", hp), ("bc2", 8),
                ("wc3", hp), ("bc3", 8)]
    offs, r = {}, 0
    for name, nr in seg_rows:
        offs[name] = r
        r += nr
    bf = jnp.bfloat16
    slab = jnp.zeros((r, hp), bf)
    slab = slab.at[offs["w1"]:offs["w1"] + in_dim, :hidden].set(p["w1"].astype(bf))
    slab = slab.at[offs["b1"]:offs["b1"] + 1, :hidden].set(p["b1"].reshape(1, -1).astype(bf))
    slab = slab.at[offs["w2"]:offs["w2"] + hidden, :hidden].set(p["w2"].astype(bf))
    slab = slab.at[offs["b2"]:offs["b2"] + 1, :hidden].set(p["b2"].reshape(1, -1).astype(bf))
    slab = slab.at[offs["wc1"]:offs["wc1"] + hidden, :hidden].set(p["wc1"].astype(bf))
    slab = slab.at[offs["bc1"]:offs["bc1"] + 1, :hidden].set(p["bc1"].reshape(1, -1).astype(bf))
    slab = slab.at[offs["wc2"]:offs["wc2"] + hidden, :hidden].set(p["wc2"].astype(bf))
    slab = slab.at[offs["bc2"]:offs["bc2"] + 1, :hidden].set(p["bc2"].reshape(1, -1).astype(bf))
    slab = slab.at[offs["wc3"]:offs["wc3"] + hidden, :n_classes].set(p["wc3"].astype(bf))
    slab = slab.at[offs["bc3"]:offs["bc3"] + 1, :n_classes].set(p["bc3"].reshape(1, -1).astype(bf))
    return slab, offs


def gcnreg_kernel(abd_ref, x_ref, slab_ref, out_ref, *, G, N, in_p, hp, offs):
    f32 = jnp.float32
    bf16 = jnp.bfloat16

    abd = abd_ref[...]            # (G*N, G*N) bf16 block-diagonal normalized adjacency
    x = x_ref[...]                # (G*N, in_p) bf16 stacked, lane-padded node features

    def seg(name, rows):          # static, 8-row-aligned slices of the resident slab
        return slab_ref[offs[name]:offs[name] + rows, :]

    w1, b1 = seg("w1", in_p), seg("b1", 1)
    w2, b2 = seg("w2", hp), seg("b2", 1)
    wc1, bc1 = seg("wc1", hp), seg("bc1", 1)
    wc2, bc2 = seg("wc2", hp), seg("bc2", 1)
    wc3, bc3 = seg("wc3", hp), seg("bc3", 1)

    # conv1: relu( A @ (X @ W1) + b1 ), all G graphs stacked (M = G*N rows)
    xw = jnp.dot(x, w1, preferred_element_type=f32)                        # (G*N, hp)
    h = jnp.dot(abd, xw.astype(bf16), preferred_element_type=f32)
    h = jnp.maximum(h + b1.astype(f32), 0.0)

    # conv2: relu( A @ (h @ W2) + b2 )
    hw = jnp.dot(h.astype(bf16), w2, preferred_element_type=f32)
    h = jnp.dot(abd, hw.astype(bf16), preferred_element_type=f32)
    h = jnp.maximum(h + b2.astype(f32), 0.0)                               # (G*N, hp)

    # dgl.mean_nodes per graph, then the batched 3-layer MLP head (M = G rows)
    pooled = jnp.mean(h.reshape(G, N, hp), axis=1)                         # (G, hp)
    o = jnp.maximum(jnp.dot(pooled.astype(bf16), wc1, preferred_element_type=f32)
                    + bc1.astype(f32), 0.0)
    o = jnp.maximum(jnp.dot(o.astype(bf16), wc2, preferred_element_type=f32)
                    + bc2.astype(f32), 0.0)
    o = jnp.dot(o.astype(bf16), wc3, preferred_element_type=f32) + bc3.astype(f32)

    out_ref[...] = o                                                       # (G, hp) lane-dense store


def gcnreg_forward(a_norm, x, params, *, hidden, n_classes):
    """a_norm: (B, N, N) normalized adjacencies; x: (B, N, in_dim)."""
    B, N, _ = a_norm.shape
    in_dim = x.shape[-1]
    hp = _ru(max(hidden, n_classes), 128)     # padded lane width for hidden dims
    in_p = _ru(in_dim, 128)                   # lane-dense feature width

    G = _pick_group(B, N)                     # graphs per grid step
    S = B // G                                # grid steps
    GN = G * N

    # Block-diagonal normalized adjacency per sub-batch of G graphs (bf16, lane-dense).
    a_g = a_norm.reshape(S, G, N, N).astype(jnp.bfloat16)
    eye_g = jnp.eye(G, dtype=jnp.bfloat16)
    a_bd = (a_g[:, :, :, None, :] * eye_g[None, :, None, :, None]).reshape(S, GN, GN)

    # Stacked, lane-padded node features (bf16). Padded columns are zero and the
    # matching W1 rows are zero, so they contribute nothing.
    x_s = jnp.pad(x, ((0, 0), (0, 0), (0, in_p - in_dim))).astype(jnp.bfloat16)
    x_s = x_s.reshape(S, GN, in_p)

    slab, offs = pack_params(params, in_dim, in_p, hidden, n_classes, hp)
    kernel = functools.partial(gcnreg_kernel, G=G, N=N, in_p=in_p, hp=hp, offs=offs)

    # Honest cost estimate (true hidden dim, not the padded hp).
    flops = 2 * B * (N * in_dim * hidden          # X @ W1
                     + 2 * N * N * hidden         # two A aggregations
                     + N * hidden * hidden        # h @ W2
                     + 2 * hidden * hidden        # classify1, classify2
                     + hidden * n_classes)        # classify3
    bytes_accessed = 2 * (a_bd.size + x_s.size + slab.size) + 4 * B * hp
    cost = pl.CostEstimate(flops=int(flops), transcendentals=0,
                           bytes_accessed=int(bytes_accessed))

    out = pl.pallas_call(
        kernel,
        out_shape=jax.ShapeDtypeStruct((B, hp), jnp.float32),
        grid_spec=pltpu.PrefetchScalarGridSpec(
            num_scalar_prefetch=0,
            grid=(S,),
            in_specs=[
                pl.BlockSpec((None, GN, GN), lambda s: (s, 0, 0)),      # A_bd[s]
                pl.BlockSpec((None, GN, in_p), lambda s: (s, 0, 0)),    # X[s]
                pl.BlockSpec((slab.shape[0], hp), lambda s: (0, 0)),    # params (resident)
            ],
            out_specs=pl.BlockSpec((G, hp), lambda s: (s, 0)),
        ),
        compiler_params=pltpu.CompilerParams(
            dimension_semantics=("parallel",)),
        cost_estimate=cost,
    )(a_bd, x_s, slab)

    return out[:, :n_classes]


def reference_forward(a_norm, x, p):
    def single(a, xg):
        h = jnp.maximum(a @ (xg @ p["w1"]) + p["b1"], 0.0)
        h = jnp.maximum(a @ (h @ p["w2"]) + p["b2"], 0.0)
        hg = jnp.mean(h, axis=0, keepdims=True)
        o = jnp.maximum(hg @ p["wc1"] + p["bc1"], 0.0)
        o = jnp.maximum(o @ p["wc2"] + p["bc2"], 0.0)
        return (o @ p["wc3"] + p["bc3"])[0]
    return jax.vmap(single)(a_norm, x)


if __name__ == "__main__":
    # B=16, N=32 -> G=8 graphs per step (G*N=256 rows: full v6e/v7x MXU pass),
    # grid=(2,) so both v7x TensorCores get work.
    B, N, IN_DIM, HIDDEN, N_CLASSES = 16, 32, 16, 32, 4

    key = jax.random.PRNGKey(0)
    keys = jax.random.split(key, 12)

    # ---- build B small symmetric graphs (ring + per-graph deterministic chords) ----
    a_list = []
    for g in range(B):
        adj = np.zeros((N, N), dtype=np.float32)
        for i in range(N):
            j = (i + 1) % N
            adj[i, j] = adj[j, i] = 1.0
        for i in range(0, N, 3 + g):
            j = (i + N // 2 + g) % N
            if i != j:
                adj[i, j] = adj[j, i] = 1.0
        deg = adj.sum(axis=1)
        d_inv_sqrt = 1.0 / np.sqrt(np.maximum(deg, 1.0))
        a_list.append(d_inv_sqrt[:, None] * adj * d_inv_sqrt[None, :])
    a_norm = jnp.asarray(np.stack(a_list), dtype=jnp.float32)   # (B, N, N)

    # ---- node features and deterministic parameters ----
    x = jax.random.normal(keys[0], (B, N, IN_DIM), dtype=jnp.float32)
    params = {
        # GraphConv weights stored (in_feats, out_feats), as in DGL
        "w1": 0.1 * jax.random.normal(keys[1], (IN_DIM, HIDDEN), jnp.float32),
        "b1": 0.1 * jax.random.normal(keys[2], (1, HIDDEN), jnp.float32),
        "w2": 0.1 * jax.random.normal(keys[3], (HIDDEN, HIDDEN), jnp.float32),
        "b2": 0.1 * jax.random.normal(keys[4], (1, HIDDEN), jnp.float32),
        # nn.Linear weights stored pre-transposed (in, out): y = x @ W + b
        "wc1": 0.1 * jax.random.normal(keys[5], (HIDDEN, HIDDEN), jnp.float32),
        "bc1": 0.1 * jax.random.normal(keys[6], (1, HIDDEN), jnp.float32),
        "wc2": 0.1 * jax.random.normal(keys[7], (HIDDEN, HIDDEN), jnp.float32),
        "bc2": 0.1 * jax.random.normal(keys[8], (1, HIDDEN), jnp.float32),
        "wc3": 0.1 * jax.random.normal(keys[9], (HIDDEN, N_CLASSES), jnp.float32),
        "bc3": 0.1 * jax.random.normal(keys[10], (1, N_CLASSES), jnp.float32),
    }

    out = gcnreg_forward(a_norm, x, params, hidden=HIDDEN, n_classes=N_CLASSES)
    out = jax.block_until_ready(out)

    # Reference runs in f32; kernel uses bf16 MXU operands with f32 accumulation,
    # so tolerance is loosened accordingly (per perf review).
    ref = reference_forward(a_norm, x, params)
    np.testing.assert_allclose(np.asarray(out), np.asarray(ref),
                               rtol=2e-2, atol=1e-2)

    # TODO(synk): saliency=True branch (output.backward() -> h.grad) is an
    # autograd feature, not a forward op, and is not implemented here.
    # TODO(synk): jnp.mean divides by the full N; variable-size graphs padded to
    # a common N would need per-graph node counts via scalar prefetch.
    print("KERNEL_OK")
</pallas_src>

<mosaic_0001>
module attributes {stable_mosaic.version = 11 : i64} {
  func.func @gcnreg_kernel(%arg0: i32, %arg1: memref<1x256x256xbf16, #tpu.memory_space<vmem>>, %arg2: memref<1x256x128xbf16, #tpu.memory_space<vmem>>, %arg3: memref<680x128xbf16, #tpu.memory_space<vmem>>, %arg4: memref<8x128xf32, #tpu.memory_space<vmem>>) attributes {dimension_semantics = [#tpu.dimension_semantics<parallel>], iteration_bounds = array<i64: 2>, scalar_prefetch = 0 : i64, scratch_operands = 0 : i64, tpu.core_type = #tpu.core_type<tc>, window_params = [{transform_indices = @transform_0, window_bounds = array<i64: 1, 256, 256>}, {transform_indices = @transform_1, window_bounds = array<i64: 1, 256, 128>}, {pipeline_mode = #tpu.pipeline_mode<synchronous>, transform_indices = @transform_2, window_bounds = array<i64: 680, 128>}, {transform_indices = @transform_3, window_bounds = array<i64: 8, 128>}]} {
    %c0 = arith.constant 0 : index
    %c0_0 = arith.constant 0 : index
    %c0_1 = arith.constant 0 : index
    %0 = vector.load %arg1[%c0, %c0_0, %c0_1] : memref<1x256x256xbf16, #tpu.memory_space<vmem>>, vector<1x256x256xbf16>
    %1 = vector.shape_cast %0 : vector<1x256x256xbf16> to vector<256x256xbf16>
    %c0_2 = arith.constant 0 : index
    %c0_3 = arith.constant 0 : index
    %c0_4 = arith.constant 0 : index
    %2 = vector.load %arg2[%c0_2, %c0_3, %c0_4] : memref<1x256x128xbf16, #tpu.memory_space<vmem>>, vector<1x256x128xbf16>
    %3 = vector.shape_cast %2 : vector<1x256x128xbf16> to vector<256x128xbf16>
    %c0_5 = arith.constant 0 : index
    %c0_6 = arith.constant 0 : index
    %4 = vector.load %arg3[%c0_5, %c0_6] : memref<680x128xbf16, #tpu.memory_space<vmem>>, vector<128x128xbf16>
    %c128 = arith.constant 128 : index
    %c0_7 = arith.constant 0 : index
    %5 = vector.load %arg3[%c128, %c0_7] : memref<680x128xbf16, #tpu.memory_space<vmem>>, vector<1x128xbf16>
    %c136 = arith.constant 136 : index
    %c0_8 = arith.constant 0 : index
    %6 = vector.load %arg3[%c136, %c0_8] : memref<680x128xbf16, #tpu.memory_space<vmem>>, vector<128x128xbf16>
    %c264 = arith.constant 264 : index
    %c0_9 = arith.constant 0 : index
    %7 = vector.load %arg3[%c264, %c0_9] : memref<680x128xbf16, #tpu.memory_space<vmem>>, vector<1x128xbf16>
    %c272 = arith.constant 272 : index
    %c0_10 = arith.constant 0 : index
    %8 = vector.load %arg3[%c272, %c0_10] : memref<680x128xbf16, #tpu.memory_space<vmem>>, vector<128x128xbf16>
    %c400 = arith.constant 400 : index
    %c0_11 = arith.constant 0 : index
    %9 = vector.load %arg3[%c400, %c0_11] : memref<680x128xbf16, #tpu.memory_space<vmem>>, vector<1x128xbf16>
    %c408 = arith.constant 408 : index
    %c0_12 = arith.constant 0 : index
    %10 = vector.load %arg3[%c408, %c0_12] : memref<680x128xbf16, #tpu.memory_space<vmem>>, vector<128x128xbf16>
    %c536 = arith.constant 536 : index
    %c0_13 = arith.constant 0 : index
    %11 = vector.load %arg3[%c536, %c0_13] : memref<680x128xbf16, #tpu.memory_space<vmem>>, vector<1x128xbf16>
    %c544 = arith.constant 544 : index
    %c0_14 = arith.constant 0 : index
    %12 = vector.load %arg3[%c544, %c0_14] : memref<680x128xbf16, #tpu.memory_space<vmem>>, vector<128x128xbf16>
    %c672 = arith.constant 672 : index
    %c0_15 = arith.constant 0 : index
    %13 = vector.load %arg3[%c672, %c0_15] : memref<680x128xbf16, #tpu.memory_space<vmem>>, vector<1x128xbf16>
    %cst = arith.constant dense<0.000000e+00> : vector<256x128xf32>
    %14 = tpu.matmul %3, %4, %cst {dimension_numbers = #tpu.dot_dimension_numbers<[1], [0], [0], [1], [0, 0, 1, 1], [], []>} : vector<256x128xbf16>, vector<128x128xbf16>, vector<256x128xf32> -> vector<256x128xf32>
    %15 = arith.truncf %14 : vector<256x128xf32> to vector<256x128xbf16>
    %cst_16 = arith.constant dense<0.000000e+00> : vector<256x128xf32>
    %16 = tpu.matmul %1, %15, %cst_16 {dimension_numbers = #tpu.dot_dimension_numbers<[1], [0], [0], [1], [0, 0, 1, 1], [], []>} : vector<256x256xbf16>, vector<256x128xbf16>, vector<256x128xf32> -> vector<256x128xf32>
    %17 = arith.extf %5 : vector<1x128xbf16> to vector<1x128xf32>
    %18 = vector.broadcast %17 : vector<1x128xf32> to vector<256x128xf32>
    %19 = arith.addf %16, %18 : vector<256x128xf32>
    %cst_17 = arith.constant 0.000000e+00 : f32
    %20 = vector.broadcast %cst_17 : f32 to vector<256x128xf32>
    %21 = arith.maximumf %19, %20 : vector<256x128xf32>
    %22 = arith.truncf %21 : vector<256x128xf32> to vector<256x128xbf16>
    %cst_18 = arith.constant dense<0.000000e+00> : vector<256x128xf32>
    %23 = tpu.matmul %22, %6, %cst_18 {dimension_numbers = #tpu.dot_dimension_numbers<[1], [0], [0], [1], [0, 0, 1, 1], [], []>} : vector<256x128xbf16>, vector<128x128xbf16>, vector<256x128xf32> -> vector<256x128xf32>
    %24 = arith.truncf %23 : vector<256x128xf32> to vector<256x128xbf16>
    %cst_19 = arith.constant dense<0.000000e+00> : vector<256x128xf32>
    %25 = tpu.matmul %1, %24, %cst_19 {dimension_numbers = #tpu.dot_dimension_numbers<[1], [0], [0], [1], [0, 0, 1, 1], [], []>} : vector<256x256xbf16>, vector<256x128xbf16>, vector<256x128xf32> -> vector<256x128xf32>
    %26 = arith.extf %7 : vector<1x128xbf16> to vector<1x128xf32>
    %27 = vector.broadcast %26 : vector<1x128xf32> to vector<256x128xf32>
    %28 = arith.addf %25, %27 : vector<256x128xf32>
    %cst_20 = arith.constant 0.000000e+00 : f32
    %29 = vector.broadcast %cst_20 : f32 to vector<256x128xf32>
    %30 = arith.maximumf %28, %29 : vector<256x128xf32>
    %31 = vector.shape_cast %30 : vector<256x128xf32> to vector<8x32x128xf32>
    %cst_21 = arith.constant dense<0.000000e+00> : vector<8x128xf32>
    %32 = vector.multi_reduction <add>, %31, %cst_21 [1] : vector<8x32x128xf32> to vector<8x128xf32>
    %cst_22 = arith.constant 3.200000e+01 : f32
    %33 = vector.broadcast %cst_22 : f32 to vector<8x128xf32>
    %34 = arith.divf %32, %33 : vector<8x128xf32>
    %35 = arith.truncf %34 : vector<8x128xf32> to vector<8x128xbf16>
    %cst_23 = arith.constant dense<0.000000e+00> : vector<8x128xf32>
    %36 = tpu.matmul %35, %8, %cst_23 {dimension_numbers = #tpu.dot_dimension_numbers<[1], [0], [0], [1], [0, 0, 1, 1], [], []>} : vector<8x128xbf16>, vector<128x128xbf16>, vector<8x128xf32> -> vector<8x128xf32>
    %37 = arith.extf %9 : vector<1x128xbf16> to vector<1x128xf32>
    %38 = vector.broadcast %37 : vector<1x128xf32> to vector<8x128xf32>
    %39 = arith.addf %36, %38 : vector<8x128xf32>
    %cst_24 = arith.constant 0.000000e+00 : f32
    %40 = vector.broadcast %cst_24 : f32 to vector<8x128xf32>
    %41 = arith.maximumf %39, %40 : vector<8x128xf32>
    %42 = arith.truncf %41 : vector<8x128xf32> to vector<8x128xbf16>
    %cst_25 = arith.constant dense<0.000000e+00> : vector<8x128xf32>
    %43 = tpu.matmul %42, %10, %cst_25 {dimension_numbers = #tpu.dot_dimension_numbers<[1], [0], [0], [1], [0, 0, 1, 1], [], []>} : vector<8x128xbf16>, vector<128x128xbf16>, vector<8x128xf32> -> vector<8x128xf32>
    %44 = arith.extf %11 : vector<1x128xbf16> to vector<1x128xf32>
    %45 = vector.broadcast %44 : vector<1x128xf32> to vector<8x128xf32>
    %46 = arith.addf %43, %45 : vector<8x128xf32>
    %cst_26 = arith.constant 0.000000e+00 : f32
    %47 = vector.broadcast %cst_26 : f32 to vector<8x128xf32>
    %48 = arith.maximumf %46, %47 : vector<8x128xf32>
    %49 = arith.truncf %48 : vector<8x128xf32> to vector<8x128xbf16>
    %cst_27 = arith.constant dense<0.000000e+00> : vector<8x128xf32>
    %50 = tpu.matmul %49, %12, %cst_27 {dimension_numbers = #tpu.dot_dimension_numbers<[1], [0], [0], [1], [0, 0, 1, 1], [], []>} : vector<8x128xbf16>, vector<128x128xbf16>, vector<8x128xf32> -> vector<8x128xf32>
    %51 = arith.extf %13 : vector<1x128xbf16> to vector<1x128xf32>
    %52 = vector.broadcast %51 : vector<1x128xf32> to vector<8x128xf32>
    %53 = arith.addf %50, %52 : vector<8x128xf32>
    %c0_28 = arith.constant 0 : index
    %c0_29 = arith.constant 0 : index
    %54 = vector.load %arg4[%c0_28, %c0_29] : memref<8x128xf32, #tpu.memory_space<vmem>>, vector<8x128xf32>
    tpu.vector_store %arg4[%c0_28, %c0_29], %53 {strides = array<i32>} : memref<8x128xf32, #tpu.memory_space<vmem>>, vector<8x128xf32>,
    return
  }
  func.func @transform_0(%arg0: i32) -> (i32, i32, i32) {
    %c0_i32 = arith.constant 0 : i32
    %c0_i32_0 = arith.constant 0 : i32
    %c0_i32_1 = arith.constant 0 : i32
    return %arg0, %c0_i32, %c0_i32_0 : i32, i32, i32
  }
  func.func @transform_1(%arg0: i32) -> (i32, i32, i32) {
    %c0_i32 = arith.constant 0 : i32
    %c0_i32_0 = arith.constant 0 : i32
    %c0_i32_1 = arith.constant 0 : i32
    return %arg0, %c0_i32, %c0_i32_0 : i32, i32, i32
  }
  func.func @transform_2(%arg0: i32) -> (i32, i32) {
    %c0_i32 = arith.constant 0 : i32
    %c0_i32_0 = arith.constant 0 : i32
    %c0_i32_1 = arith.constant 0 : i32
    return %c0_i32, %c0_i32_0 : i32, i32
  }
  func.func @transform_3(%arg0: i32) -> (i32, i32) {
    %c0_i32 = arith.constant 0 : i32
    %c0_i32_0 = arith.constant 0 : i32
    return %arg0, %c0_i32 : i32, i32
  }
}

</mosaic_0001>

<bundles_post_ra>
// kernel: tpu_custom_call.1
= control target key start
LH: loop header
LB: loop body
LE: loop exit
PB: predicated region body
PF: predicated region fallthrough
CT: control target
= control target key end

     0   :  { %s3514_s0 = inlined_call_operand.hbm [shape: bf16[2,256,256], index: 0, kind: input, shape index: {}]   ;;  %s3515_s1 = inlined_call_operand.hbm [shape: bf16[2,256,128], index: 1, kind: input, shape index: {}]   ;;  %s3516_s2 = inlined_call_operand.hbm [shape: bf16[680,128], index: 2, kind: input, shape index: {}]   ;;  %s3517_s3 = inlined_call_operand.hbm [shape: f32[16,128], index: 3, kind: output, shape index: {}]  }
   0x1   :  { %3523 = sst [smem:[#allocation13_spill]] %s3514_s0 }
   0x2   :  { %8 = vsyncpa [#allocation3], 0 }
   0x3   :  { %10 = vsyncpa [#allocation3 + $0x1], 0 }
   0x4   :  { %11 = vsyncpa [#allocation6], 0 }
   0x5   :  { %13 = vsyncpa [#allocation6 + $0x1], 0 }
   0x6   :  { %14 = vsyncpa [#allocation4], 0 }
   0x7   :  { %16 = vsyncpa [#allocation4 + $0x1], 0  ;;  %s2978_s12 = smov 0   ;;  %s2980_s13 = smov 0  }
   0x8   :  { %s2982_s14 = smov 0   ;;  %s2984_s15 = smov 0  }
   0x9 LB: > { %s2999_s16 = sadd.s32 4294967295, %s2946_s15   ;;  %s2032_s17 = sadd.s32 4294967294, %s2946_s15   ;;  %s2946_s15 = sphi %s2984_s15, %s3543_s15   ;;  %s2942_s14 = sphi %s2982_s14, %s3542_s14   ;;  %s2938_s13 = sphi %s2980_s13, %s3541_s13   ;;  %s2934_s12 = sphi %s2978_s12, %s3540_s12  }
   0xa   : > { %p42_p0 = scmp.ne.s32.totalorder %s2938_s13, %s2934_s12  ;;  %p3518_p1 = scmp.eq.s32.totalorder %s2999_s16, 0 }
   0xb   : > { %p119_p3 = scmp.eq.s32.totalorder %s2032_s17, 1  ;;  %p2033_p5 = scmp.ge.s32.totalorder %s2946_s15, 1 }
   0xc   : > { %p3008_p4 = por %p3518_p1, %p42_p0  ;;  %p126_p7 = scmp.lt.s32.totalorder %s2946_s15, 3 }
   0xd   : > { %p3013_p6 = por %p119_p3, %p42_p0  ;;  %s2948_s21 = smov [#allocation7]  }
   0xe   : > { %s3524_s18 = scalar_select %p3008_p4, 1, 0 }
   0xf   : > { %s3525_s19 = scalar_select %p3013_p6, 1, 0 }
  0x10   : > { %p3018_p8 = pnand %p2033_p5, %p126_p7  ;;  %s138_s22 = sshll.u32 %s2948_s21, 4  ;;  %s3022_s22 = int_to_ptr.vmem [resolvable:$true] %s138_s22 }
  0x11   : > { %s3034_s24 = sadd.s32 1, %s2946_s15   ;;  %s29_s25 = sadd.s32 1, %s2942_s14 }
  0x12   : > { %s3526_s20 = scalar_select %p3018_p8, 1, 0 }
  0x13   : > { %p2622_p9 = pneg %p3018_p8  ;;  %s26_s26 = ssub.s32 %s2946_s15, %s3034_s24 }
  0x14   : > { %s2784_s29 = scalar_lea.hbm %s3516_s2, 5440 }
  0x15   : > { %p3029_p11 = pnand %p2622_p9, %p3518_p1  ;;  %p2785_p12 = scmp.ne.s32.totalorder %s3516_s2, %s2784_s29 }
  0x16   : > { %p2791_p5 = scmp.lt.u32.totalorder %s2784_s29, %s3516_s2 }
  0x17   : > { %p2786_p13 = pneg %p3029_p11 }
  0x19   : > { %p2787_p0 = pnand %p2786_p13, %p2785_p12 }
  0x1b   : > { %p2788_p3 = pneg %p2787_p0 }
  0x1d   : > { %p2793_p7 = pnand %p2791_p5, %p2788_p3 }
  0x1f   : > { %2796 = shalt.err (!%p2793_p7)
}
  0x20   : > { %s2797_s7 = scalar_lea.vmem %s3022_s22, 5440  ;;  %p2805_p2 = scmp.lt.s32.totalorder %s3022_s22, %s3022_s22 }
  0x21   : > { %p2798_p9 = scmp.ne.s32.totalorder %s3022_s22, %s2797_s7  ;;  %p2806_p6 = scmp.lt.s32.totalorder %s2797_s7, %s2797_s7 }
  0x23   : > { %p2800_p10 = pnand %p2798_p9, %p2786_p13  ;;  %p2807_p4 = por %p2806_p6, %p2805_p2 }
  0x25   : > { %p2801_p1 = pneg %p2800_p10 }
  0x27   : > { %p2808_p8 = pnand %p2807_p4, %p2801_p1 }
  0x29   : > { %2811 = shalt.err (!%p2808_p8)
}
  0x2a   : > { %s3521_s8 = smov 64   ;;  %s3522_s9 = smov 4  }
  0x2b   : > { %2625 = dma.hbm_to_vmem [thread:$0]  (!%p3029_p11), %s3516_s2, 5440, %s3022_s22, [#allocation6], %s3521_s8, %s3521_s8, %s3522_s9  }
  0x2c   : > { %p27_p1 = scmp.eq.s32.totalorder %s26_s26, 0  ;;  %p36_p2 = scmp.ne.s32.totalorder %s2942_s14, %s2938_s13 }
  0x2d   : > { %p37_p4 = scmp.eq.s32.totalorder %s2946_s15, 0  ;;  %p2638_p6 = scmp.lt.s32.totalorder %s2946_s15, 2 }
  0x2e   : > { %s3068_s17 = scalar_select %p27_p1, %s2942_s14, %s29_s25  }
  0x2f   : > { %p38_p8 = por %p37_p4, %p36_p2  ;;  %p3528_p10 = scmp.eq.s32.totalorder %s2999_s16, 1 }
  0x30   : > { %s3077_s23 = sand.u32 1, %s2942_s14   ;;  %s2139_s27 = sshll.u32 %s2946_s15, 12 }
  0x31   : > { %p3072_p12 = por %p3528_p10, %p36_p2  ;;  %s2036_s28 = sshll.u32 %s3077_s23, 8 }
  0x32   : > { %s3530_s0 = sld [smem:[#allocation13_spill]]  ;;  %s156_s25 = scalar_lea.vmem [#allocation2], %s2036_s28 }
  0x33   : > { %s163_s30 = sshll.u32 %s156_s25, 4  ;;  %p3086_p11 = pnand %p2638_p6, %p38_p8  ;;  %s3090_s30 = int_to_ptr.vmem [resolvable:$true] %s163_s30 }
  0x34   : > { %s153_s5 = scalar_lea.sflag [#allocation3], %s3077_s23 }
  0x35   : > { %p2814_p0 = pneg %p3086_p11 }
  0x38   : > { %s3084_s26 = scalar_lea.hbm %s3530_s0, %s2139_s27  ;;  %s2817_s11 = scalar_lea.hbm %s3530_s0, 8192 }
  0x39   : > { %s2812_s6 = scalar_lea.hbm %s3084_s26, 4096  ;;  %p2818_p7 = scmp.lt.u32.totalorder %s3084_s26, %s3530_s0 }
  0x3a   : > { %p2813_p13 = scmp.ne.s32.totalorder %s3084_s26, %s2812_s6  ;;  %p2819_p9 = scmp.lt.u32.totalorder %s2817_s11, %s2812_s6 }
  0x3b   : > { %p2821_p2 = scmp.lt.u32.totalorder %s2812_s6, %s3084_s26 }
  0x3c   : > { %p2815_p3 = pnand %p2814_p0, %p2813_p13  ;;  %p2820_p1 = por %p2819_p9, %p2818_p7 }
  0x3e   : > { %p2816_p5 = pneg %p2815_p3  ;;  %p2822_p4 = por %p2821_p2, %p2820_p1 }
  0x40   : > { %p2823_p6 = pnand %p2822_p4, %p2816_p5 }
  0x42   : > { %2826 = shalt.err (!%p2823_p6)
}
  0x43   : > { %s2827_s29 = scalar_lea.vmem %s3090_s30, 4096  ;;  %s2951_s22 = smov [#allocation2]  }
  0x44   : > { %p2828_p8 = scmp.ne.s32.totalorder %s3090_s30, %s2827_s29  ;;  %s2832_s25 = sshll.u32 %s2951_s22, 4  ;;  %s2833_s25 = int_to_ptr.vmem [resolvable:$false] %s2832_s25 }
  0x45   : > { %s2834_s7 = scalar_lea.vmem %s2833_s25, 8192  ;;  %p2835_p3 = scmp.lt.s32.totalorder %s3090_s30, %s2833_s25 }
  0x46   : > { %p2830_p10 = pnand %p2828_p8, %p2814_p0  ;;  %p2836_p7 = scmp.lt.s32.totalorder %s2834_s7, %s2827_s29 }
  0x48   : > { %p2831_p13 = pneg %p2830_p10  ;;  %p2837_p9 = por %p2836_p7, %p2835_p3 }
  0x4a   : > { %p2838_p1 = pnand %p2837_p9, %p2831_p13 }
  0x4c   : > { %2841 = shalt.err (!%p2838_p1)
}
  0x4d   : > { %s2952_s6 = smov 128   ;;  %s2953_s10 = smov 8  }
  0x4e   : > { %2629 = dma.hbm_to_vmem [thread:$0]  (!%p3086_p11), %s3084_s26, 4096, %s3090_s30, %s153_s5, %s2952_s6, %s2952_s6, %s2953_s10  }
  0x4f   : > { %s173_s11 = sand.u32 1, %s2946_s15   ;;  %s2039_s27 = sshll.u32 %s3077_s23, 7 }
  0x50   : > { %s2140_s28 = sshll.u32 %s2946_s15, 11  ;;  %s177_s29 = scalar_lea.vmem [#allocation5], %s2039_s27 }
  0x51   : > { %s184_s22 = sshll.u32 %s177_s29, 4  ;;  %s3126_s8 = scalar_lea.hbm %s3515_s1, %s2140_s28  ;;  %s3128_s22 = int_to_ptr.vmem [resolvable:$true] %s184_s22 }
  0x52   : > { %s3130_s9 = scalar_lea.sflag [#allocation6], %s173_s11  ;;  %s2842_s0 = scalar_lea.hbm %s3126_s8, 2048 }
  0x53   : > { %p2843_p5 = scmp.ne.s32.totalorder %s3126_s8, %s2842_s0  ;;  %s2847_s30 = scalar_lea.hbm %s3515_s1, 4096 }
  0x54   : > { %p2848_p6 = scmp.lt.u32.totalorder %s3126_s8, %s3515_s1  ;;  %p2849_p8 = scmp.lt.u32.totalorder %s2847_s30, %s2842_s0 }
  0x55   : > { %p2845_p2 = pnand %p2843_p5, %p2814_p0  ;;  %p2851_p13 = scmp.lt.u32.totalorder %s2842_s0, %s3126_s8 }
  0x56   : > { %p2850_p10 = por %p2849_p8, %p2848_p6 }
  0x57   : > { %p2846_p4 = pneg %p2845_p2 }
  0x58   : > { %p2852_p3 = por %p2851_p13, %p2850_p10 }
  0x5a   : > { %p2853_p7 = pnand %p2852_p3, %p2846_p4 }
  0x5c   : > { %2856 = shalt.err (!%p2853_p7)
}
  0x5d   : > { %s2857_s10 = scalar_lea.vmem %s3128_s22, 2048  ;;  %s2954_s11 = smov [#allocation5]  }
  0x5e   : > { %p2858_p9 = scmp.ne.s32.totalorder %s3128_s22, %s2857_s10  ;;  %s2862_s27 = sshll.u32 %s2954_s11, 4  ;;  %s2863_s27 = int_to_ptr.vmem [resolvable:$false] %s2862_s27 }
  0x5f   : > { %s2864_s28 = scalar_lea.vmem %s2863_s27, 4096  ;;  %p2865_p2 = scmp.lt.s32.totalorder %s3128_s22, %s2863_s27 }
  0x60   : > { %p2860_p1 = pnand %p2858_p9, %p2814_p0  ;;  %p2866_p6 = scmp.lt.s32.totalorder %s2864_s28, %s2857_s10 }
  0x62   : > { %p2861_p5 = pneg %p2860_p1  ;;  %p2867_p8 = por %p2866_p6, %p2865_p2 }
  0x64   : > { %p2868_p10 = pnand %p2867_p8, %p2861_p5 }
  0x66   : > { %2871 = shalt.err (!%p2868_p10)
}
  0x67   : > { %s3532_s0 = smov 4   ;;  %s3533_s29 = smov 64  }
  0x68   : > { %2632 = dma.hbm_to_vmem [thread:$0]  (!%p3086_p11), %s3126_s8, 2048, %s3128_s22, %s3130_s9, %s3533_s29, %s3533_s29, %s3532_s0  }
  0x69   : > { %p3534_p0 = scmp.ne.s32.totalorder %s3526_s20, 0 }
  0x6a   : > { %s3162_s25 = sand.u32 (!%p3534_p0), 1, %s2938_s13   ;;  %p3535_p4 = scmp.ne.s32.totalorder (!%p3534_p0), %s3524_s18, 0 }
  0x6b   : > { %196 = sbr.rel (%p3534_p0) target bundleno = 1999 (0x7cf), region = 32  ;;  %s2043_s7 = sshll.u32 (!%p3534_p0), %s3162_s25, 8 }
  0x6c   : > { %s199_s23 = scalar_lea.sflag (!%p3534_p0), [#allocation3], %s3162_s25  ;;  %s3166_s26 = scalar_lea.vmem (!%p3534_p0), [#allocation2], %s2043_s7 }
  0x72   : > { %2917 = dma.done.wait (%p3535_p4), %s199_s23, 4096  }
  0x73   : > { %2919 = vsyncadd (%p3535_p4), %s199_s23, 4294963200  ;;  %s207_s20 = sand.u32 1, %s2999_s16   ;;  %s2044_s8 = sshll.u32 %s3162_s25, 7 }
  0x74   : > { %s208_s9 = scalar_lea.sflag [#allocation6], %s207_s20  ;;  %s3174_s4 = scalar_lea.vmem [#allocation5], %s2044_s8 }
  0x75   : > { %2921 = dma.done.wait (%p3535_p4), %s208_s9, 2048  }
  0x76   : > { %2923 = vsyncadd (%p3535_p4), %s208_s9, 4294965248  ;;  %p3536_p11 = scmp.eq.s32.totalorder %s2999_s16, 0 }
  0x78   : > { %2925 = dma.done.wait (%p3536_p11), [#allocation6], 5440   ;;  %p3537_p13 = pmov %p3536_p11 }
  0x79   : > { %v2680_v0 = vld [vmem:[#allocation7] sm:$0xff]   ;;  %v2681_v1 = vld [vmem:[#allocation7 + $0x8] sm:$0xff]   ;;  %v2682_v2 = vld [vmem:[#allocation7 + $0x10] sm:$0xff]   ;;  %vm2956_vm0 = vmmov 0   ;;  %vm1621_vm1 = vcmask 1041409   ;;  %vm1623_vm2 = vcmask 1042434  }
  0x7a   : > { %2927 = vsyncadd (%p3537_p13), [#allocation6], 4294961856  ;;  %2440 = vmatprep.subr.bf16.mxu0 %v2680_v0  ;;  %2596 = vmatprep.subr.bf16.mxu1 %v2680_v0  ;;  %v2683_v3 = vld [vmem:[#allocation7 + $0x18] sm:$0xff]   ;;  %v2688_v4 = vld [vmem:[%s3174_s4] sm:$0xff]   ;;  %vm1625_vm3 = vcmask 1043459   ;;  %vm1627_vm4 = vcmask 1044484  }
  0x7b   : > { %2441 = vmatpush3.bf16.msra.mxu0 %v2680_v0  ;;  %2604 = vmatpush3.bf16.msra.mxu1 %v2680_v0  ;;  %v2689_v5 = vld [vmem:[%s3174_s4 + $0x40] sm:$0xff]   ;;  %v2685_v7 = vld [vmem:[#allocation7 + $0x28] sm:$0xff]   ;;  %v2686_v8 = vld [vmem:[#allocation7 + $0x30] sm:$0xff]   ;;  %vm1629_vm5 = vcmask 1045509   ;;  %vm1631_vm6 = vcmask 1046534   ;;  %vm1633_vm7 = vcmask 1047559  }
  0x7c   : > { %2442 = vmatprep.subr.bf16.mxu0 %v2681_v1  ;;  %2597 = vmatprep.subr.bf16.mxu1 %v2681_v1  ;;  %v2684_v6 = vld [vmem:[#allocation7 + $0x20] sm:$0xff]   ;;  %v2687_v9 = vld [vmem:[#allocation7 + $0x38] sm:$0xff]   ;;  %v2690_v10 = vld [vmem:[%s3174_s4 + $0x8] sm:$0xff]   ;;  %s2046_s18 = sshll.u32 %s3162_s25, 3  ;;  %s2136_s22 = sshll.u32 %s2999_s16, 7 }
  0x7d   : > { %2456 = vmatprep.mubr.bf16.mxu0 %v2688_v4  ;;  %2472 = vmatprep.mubr.bf16.mxu1 %v2689_v5  ;;  %v2691_v11 = vld [vmem:[%s3174_s4 + $0x48] sm:$0xff]   ;;  %v2692_v12 = vld [vmem:[%s3174_s4 + $0x10] sm:$0xff]   ;;  %v2694_v14 = vld [vmem:[%s3174_s4 + $0x18] sm:$0xff]   ;;  %s242_s30 = scalar_lea.vmem [#allocation8], %s2046_s18  ;;  %s3470_s11 = scalar_lea.hbm %s3517_s3, %s2136_s22 }
  0x7e   : > { %v2693_v13 = vld [vmem:[%s3174_s4 + $0x50] sm:$0xff]   ;;  %v2695_v15 = vld [vmem:[%s3174_s4 + $0x58] sm:$0xff]   ;;  %v2696_v16 = vld [vmem:[%s3174_s4 + $0x20] sm:$0xff]   ;;  %s1930_s5 = sshll.u32 %s242_s30, 4  ;;  %s1917_s27 = scalar_lea.sflag [#allocation4], %s3162_s25  ;;  %s3472_s5 = int_to_ptr.vmem [resolvable:$true] %s1930_s5 }
  0x7f   : > { %2443 = vmatpush3.bf16.msra.mxu0 %v2681_v1  ;;  %2605 = vmatpush3.bf16.msra.mxu1 %v2681_v1  ;;  %v2697_v17 = vld [vmem:[%s3174_s4 + $0x60] sm:$0xff]   ;;  %v2698_v18 = vld [vmem:[%s3174_s4 + $0x28] sm:$0xff]   ;;  %v2700_v20 = vld [vmem:[%s3174_s4 + $0x30] sm:$0xff]   ;;  %s2872_s16 = scalar_lea.vmem %s3472_s5, 128  ;;  %s2957_s28 = smov [#allocation8]  }
  0x80   : > { %2444 = vmatprep.subr.bf16.mxu0 %v2682_v2  ;;  %2598 = vmatprep.subr.bf16.mxu1 %v2682_v2  ;;  %v2699_v19 = vld [vmem:[%s3174_s4 + $0x68] sm:$0xff]   ;;  %v2701_v21 = vld [vmem:[%s3174_s4 + $0x70] sm:$0xff]   ;;  %v2702_v22 = vld [vmem:[%s3174_s4 + $0x38] sm:$0xff]   ;;  %p2873_p3 = scmp.ne.s32.totalorder %s3472_s5, %s2872_s16  ;;  %s2876_s0 = sshll.u32 %s2957_s28, 4  ;;  %s2877_s0 = int_to_ptr.vmem [resolvable:$false] %s2876_s0 }
  0x81   : > { %v2703_v23 = vld [vmem:[%s3174_s4 + $0x78] sm:$0xff]   ;;  %v3201_v24 = vld [vmem:[%s3166_s26 + $0x4] ss:$8 sps:$4 sm:$0xff]   ;;  %s2878_s29 = scalar_lea.vmem %s2877_s0, 256  ;;  %p2879_p1 = scmp.lt.s32.totalorder %s3472_s5, %s2877_s0 }
  0x82   : > { %p2874_p7 = pnand %p2873_p3, %p3072_p12  ;;  %p2880_p5 = scmp.lt.s32.totalorder %s2878_s29, %s2872_s16 }
  0x83   : > { %2445 = vmatpush3.bf16.msra.mxu0 %v2682_v2  ;;  %2606 = vmatpush3.bf16.msra.mxu1 %v2682_v2 }
  0x84   : > { %2446 = vmatprep.subr.bf16.mxu0 %v2683_v3  ;;  %2599 = vmatprep.subr.bf16.mxu1 %v2683_v3  ;;  %p2875_p9 = pneg %p2874_p7  ;;  %p2881_p2 = por %p2880_p5, %p2879_p1 }
  0x86   : > { %p2882_p6 = pnand %p2881_p2, %p2875_p9 }
  0x87   : > { %2447 = vmatpush3.bf16.msra.mxu0 %v2683_v3  ;;  %2607 = vmatpush3.bf16.msra.mxu1 %v2683_v3 }
  0x88   : > { %2448 = vmatprep.subr.bf16.mxu0 %v2684_v6  ;;  %2600 = vmatprep.subr.bf16.mxu1 %v2684_v6 }
  0x8b   : > { %2449 = vmatpush3.bf16.msra.mxu0 %v2684_v6  ;;  %2608 = vmatpush3.bf16.msra.mxu1 %v2684_v6 }
  0x8c   : > { %2450 = vmatprep.subr.bf16.mxu0 %v2685_v7  ;;  %2601 = vmatprep.subr.bf16.mxu1 %v2685_v7 }
  0x8f   : > { %2451 = vmatpush3.bf16.msra.mxu0 %v2685_v7  ;;  %2609 = vmatpush3.bf16.msra.mxu1 %v2685_v7 }
  0x90   : > { %2452 = vmatprep.subr.bf16.mxu0 %v2686_v8  ;;  %2602 = vmatprep.subr.bf16.mxu1 %v2686_v8 }
  0x93   : > { %2453 = vmatpush3.bf16.msra.mxu0 %v2686_v8  ;;  %2610 = vmatpush3.bf16.msra.mxu1 %v2686_v8 }
  0x94   : > { %2454 = vmatprep.subr.bf16.mxu0 %v2687_v9  ;;  %2603 = vmatprep.subr.bf16.mxu1 %v2687_v9 }
  0x97   : > { %2455 = vmatpush3.bf16.msra.mxu0 %v2687_v9  ;;  %2611 = vmatpush3.bf16.msra.mxu1 %v2687_v9  ;;  %v2752_v9 = vld [vmem:[#allocation7 + $0x44] sm:$0xff]  }
  0x98   : > { %2488 = vmatprep.subr.bf16.mxu0 %v2752_v9 }
  0x9a   : > { %2457 = vmatmul.mubr.bf16.vlgmr.msra.gmra.mrb[0].mxu0 %v2690_v10  ;;  %2473 = vmatmul.mubr.bf16.vlgmr.msra.gmra.mrb[0].mxu1 %v2691_v11  ;;  %v2753_v10 = vld [vmem:[#allocation7 + $0x4c] sm:$0xff]   ;;  %v3205_v11 = vld [vmem:[%s3166_s26] ss:$8 sps:$4 sm:$0xff]  }
  0x9b   : > { %2460 = vmatprep.mubr.bf16.mxu0 %v2692_v12  ;;  %2476 = vmatprep.mubr.bf16.mxu1 %v2693_v13  ;;  %v2754_v12 = vld [vmem:[#allocation7 + $0x54] sm:$0xff]  }
  0x9c   : > { %2489 = vmatpush3.bf16.msra.mxu0 %v2752_v9  ;;  %v3208_v13 = vld [vmem:[%s3166_s26 + $0x14] ss:$8 sps:$4 sm:$0xff]  }
  0x9d   : > { %2490 = vmatprep.subr.bf16.mxu0 %v2753_v10 }
  0xa0   : > { %2491 = vmatpush3.bf16.msra.mxu0 %v2753_v10 }
  0xa1   : > { %2492 = vmatprep.subr.bf16.mxu0 %v2754_v12 }
  0xa2   : > { %2461 = vmatmul.mubr.bf16.gmra.mrb[4].mxu0 %v2694_v14  ;;  %2477 = vmatmul.mubr.bf16.gmra.mrb[4].mxu1 %v2695_v15  ;;  %v3213_v14 = vld [vmem:[%s3166_s26 + $0x10] ss:$8 sps:$4 sm:$0xff]   ;;  %v3216_v15 = vld [vmem:[%s3166_s26 + $0x24] ss:$8 sps:$4 sm:$0xff]  }
  0xa3   : > { %2464 = vmatprep.mubr.bf16.mxu0 %v2696_v16  ;;  %2480 = vmatprep.mubr.bf16.mxu1 %v2697_v17  ;;  %v3221_v16 = vld [vmem:[%s3166_s26 + $0x20] ss:$8 sps:$4 sm:$0xff]   ;;  %v3224_v17 = vld [vmem:[%s3166_s26 + $0x34] ss:$8 sps:$4 sm:$0xff]  }
  0xa4   : > { %2493 = vmatpush3.bf16.msra.mxu0 %v2754_v12 }
  0xaa   : > { %2465 = vmatmul.mubr.bf16.gmra.mrb[8].mxu0 %v2698_v18  ;;  %2481 = vmatmul.mubr.bf16.gmra.mrb[8].mxu1 %v2699_v19  ;;  %v3229_v18 = vld [vmem:[%s3166_s26 + $0x30] ss:$8 sps:$4 sm:$0xff]   ;;  %v3232_v19 = vld [vmem:[%s3166_s26 + $0x44] ss:$8 sps:$4 sm:$0xff]  }
  0xab   : > { %2468 = vmatprep.mubr.bf16.mxu0 %v2700_v20  ;;  %2484 = vmatprep.mubr.bf16.mxu1 %v2701_v21  ;;  %v3237_v20 = vld [vmem:[%s3166_s26 + $0x40] ss:$8 sps:$4 sm:$0xff]   ;;  %v3240_v21 = vld [vmem:[%s3166_s26 + $0x54] ss:$8 sps:$4 sm:$0xff]  }
  0xb2   : > { %2469 = vmatmul.mubr.bf16.gmra.mrb[12].mxu0 %v2702_v22  ;;  %2485 = vmatmul.mubr.bf16.gmra.mrb[12].mxu1 %v2703_v23  ;;  %v3245_v22 = vld [vmem:[%s3166_s26 + $0x50] ss:$8 sps:$4 sm:$0xff]   ;;  %v3248_v23 = vld [vmem:[%s3166_s26 + $0x64] ss:$8 sps:$4 sm:$0xff]  }
  0xb3   : > { %911 = vmatprep.mubr.bf16.mxu1 %v3201_v24 }
 0x16d   : > { %v2458_v25 = vpop.f32.mrb[0].mxu0  ;;  %v2474_v26 = vpop.f32.mrb[0].mxu1 }
 0x16e   : > { %v571_v27 = vpop.f32.mrb[1].mxu0  ;;  %v635_v28 = vpop.f32.mrb[1].mxu1 }
 0x16f   : > { %v2459_v29 = vpop.f32.mrb[2].mxu0  ;;  %v2475_v30 = vpop.f32.mrb[2].mxu1 }
 0x170   : > { %v699_v31 = vpack.c.bf16 %v2459_v29, %v2458_v25  ;;  %v707_v32 = vpack.c.bf16 %v2475_v30, %v2474_v26  ;;  %v574_v33 = vpop.f32.mrb[3].mxu0  ;;  %v638_v34 = vpop.f32.mrb[3].mxu1  ;;  %v3253_v25 = vld [vmem:[%s3166_s26 + $0x60] ss:$8 sps:$4 sm:$0xff]   ;;  %v3256_v26 = vld [vmem:[%s3166_s26 + $0x74] ss:$8 sps:$4 sm:$0xff]  }
 0x171   : > { %v698_v35 = vpack.c.bf16 %v574_v33, %v571_v27  ;;  %v706_v36 = vpack.c.bf16 %v638_v34, %v635_v28  ;;  %v3261_v27 = vld [vmem:[%s3166_s26 + $0x70] ss:$8 sps:$4 sm:$0xff]   ;;  %v3264_v28 = vld [vmem:[%s3166_s26 + $0x84] ss:$8 sps:$4 sm:$0xff]   ;;  %v3269_v29 = vld [vmem:[%s3166_s26 + $0x80] ss:$8 sps:$4 sm:$0xff]  }
 0x172   : > { %v3272_v30 = vld [vmem:[%s3166_s26 + $0x94] ss:$8 sps:$4 sm:$0xff]   ;;  %v3285_v33 = vld [vmem:[%s3166_s26 + $0xa0] ss:$8 sps:$4 sm:$0xff]  }
 0x173   : > { %2165 = vmatprep.subr.bf16.mxu1 %v706_v36  ;;  %v3288_v34 = vld [vmem:[%s3166_s26 + $0xb4] ss:$8 sps:$4 sm:$0xff]   ;;  %v3293_v36 = vld [vmem:[%s3166_s26 + $0xb0] ss:$8 sps:$4 sm:$0xff]  }
 0x174   : > { %2166 = vmatpush3.bf16.msra.mxu1 %v698_v35  ;;  %v2755_v35 = vld [vmem:[#allocation7 + $0x5c] sm:$0xff]  }
 0x175   : > { %v2462_v37 = vpop.f32.mrb[4].mxu0  ;;  %v2478_v38 = vpop.f32.mrb[4].mxu1  ;;  %2167 = vmatprep.subr.bf16.mxu1 %v707_v32  ;;  %v3280_v32 = vld [vmem:[%s3166_s26 + $0xa4] ss:$8 sps:$4 sm:$0xff]   ;;  %2494 = vmatprep.subr.bf16.mxu0 %v2755_v35 }
 0x176   : > { %v587_v39 = vpop.f32.mrb[5].mxu0  ;;  %v651_v40 = vpop.f32.mrb[5].mxu1  ;;  %2495 = vmatpush3.bf16.msra.mxu0 %v2755_v35 }
 0x177   : > { %v2463_v41 = vpop.f32.mrb[6].mxu0  ;;  %v2479_v42 = vpop.f32.mrb[6].mxu1 }
 0x178   : > { %v701_v43 = vpack.c.bf16 %v2463_v41, %v2462_v37  ;;  %v709_v44 = vpack.c.bf16 %v2479_v42, %v2478_v38  ;;  %v590_v45 = vpop.f32.mrb[7].mxu0  ;;  %v654_v46 = vpop.f32.mrb[7].mxu1  ;;  %2168 = vmatpush3.bf16.msra.mxu1 %v699_v31  ;;  %v3277_v31 = vld [vmem:[%s3166_s26 + $0x90] ss:$8 sps:$4 sm:$0xff]   ;;  %v3296_v37 = vld [vmem:[%s3166_s26 + $0xc4] ss:$8 sps:$4 sm:$0xff]  }
 0x179   : > { %v700_v47 = vpack.c.bf16 %v590_v45, %v587_v39  ;;  %v708_v48 = vpack.c.bf16 %v654_v46, %v651_v40  ;;  %v2756_v38 = vld [vmem:[#allocation7 + $0x64] sm:$0xff]   ;;  %v2757_v39 = vld [vmem:[#allocation7 + $0x6c] sm:$0xff]   ;;  %v3304_v41 = vld [vmem:[%s3166_s26 + $0xd4] ss:$8 sps:$4 sm:$0xff]  }
 0x17a   : > { %2496 = vmatprep.subr.bf16.mxu0 %v2756_v38  ;;  %v3301_v40 = vld [vmem:[%s3166_s26 + $0xc0] ss:$8 sps:$4 sm:$0xff]   ;;  %v2758_v42 = vld [vmem:[#allocation7 + $0x74] sm:$0xff]   ;;  %v3312_v45 = vld [vmem:[%s3166_s26 + $0xe4] ss:$8 sps:$4 sm:$0xff]  }
 0x17b   : > { %2169 = vmatprep.subr.bf16.mxu1 %v708_v48  ;;  %2497 = vmatpush3.bf16.msra.mxu0 %v2756_v38  ;;  %v3317_v46 = vld [vmem:[%s3166_s26 + $0xe0] ss:$8 sps:$4 sm:$0xff]   ;;  %v3325_v48 = vld [vmem:[%s3166_s26 + $0xf0] ss:$8 sps:$4 sm:$0xff]  }
 0x17c   : > { %2170 = vmatpush3.bf16.msra.mxu1 %v700_v47  ;;  %2498 = vmatprep.subr.bf16.mxu0 %v2757_v39  ;;  %v3320_v47 = vld [vmem:[%s3166_s26 + $0xf4] ss:$8 sps:$4 sm:$0xff]  }
 0x17d   : > { %v2466_v49 = vpop.f32.mrb[8].mxu0  ;;  %v2482_v50 = vpop.f32.mrb[8].mxu1  ;;  %2171 = vmatprep.subr.bf16.mxu1 %v709_v44  ;;  %v3309_v44 = vld [vmem:[%s3166_s26 + $0xd0] ss:$8 sps:$4 sm:$0xff]  }
 0x17e   : > { %v603_v51 = vpop.f32.mrb[9].mxu0  ;;  %v667_v52 = vpop.f32.mrb[9].mxu1 }
 0x17f   : > { %v2467_v53 = vpop.f32.mrb[10].mxu0  ;;  %v2483_v54 = vpop.f32.mrb[10].mxu1  ;;  %2499 = vmatpush3.bf16.msra.mxu0 %v2757_v39 }
 0x180   : > { %v703_v55 = vpack.c.bf16 %v2467_v53, %v2466_v49  ;;  %v711_v56 = vpack.c.bf16 %v2483_v54, %v2482_v50  ;;  %v606_v57 = vpop.f32.mrb[11].mxu0  ;;  %v670_v58 = vpop.f32.mrb[11].mxu1  ;;  %2172 = vmatpush3.bf16.msra.mxu1 %v701_v43  ;;  %2500 = vmatprep.subr.bf16.mxu0 %v2758_v42  ;;  %v2759_v43 = vld [vmem:[#allocation7 + $0x7c] sm:$0xff]   ;;  %v715_v49 = vlaneseq }
 0x181   : > { %v702_v59 = vpack.c.bf16 %v606_v57, %v603_v51  ;;  %v710_v60 = vpack.c.bf16 %v670_v58, %v667_v52  ;;  %v324_v51 = vld [vmem:[#allocation7 + $0x40] sm:$0x1] }
 0x182   : > { %v716_v50 = vshrl.u32 %v715_v49, 7  ;;  %v714_v52 = vunpack.c.l.bf16 %v324_v51 }
 0x183   : > { %2173 = vmatprep.subr.bf16.mxu1 %v710_v60  ;;  %2501 = vmatpush3.bf16.msra.mxu0 %v2758_v42 }
 0x184   : > { %2174 = vmatpush3.bf16.msra.mxu1 %v702_v59  ;;  %2502 = vmatprep.subr.bf16.mxu0 %v2759_v43  ;;  %v3328_v53 = vsub.s32 0, %v716_v50 }
 0x185   : > { %v2470_v61 = vpop.f32.mrb[12].mxu0  ;;  %v2486_v62 = vpop.f32.mrb[12].mxu1  ;;  %2175 = vmatprep.subr.bf16.mxu1 %v711_v56 }
 0x186   : > { %v619_v63 = vpop.f32.mrb[13].mxu0  ;;  %v683_v0 = vpop.f32.mrb[13].mxu1 }
 0x187   : > { %v2471_v1 = vpop.f32.mrb[14].mxu0  ;;  %v2487_v2 = vpop.f32.mrb[14].mxu1  ;;  %2503 = vmatpush3.bf16.msra.mxu0 %v2759_v43 }
 0x188   : > { %v705_v3 = vpack.c.bf16 %v2471_v1, %v2470_v61  ;;  %v713_v4 = vpack.c.bf16 %v2487_v2, %v2486_v62  ;;  %v622_v5 = vpop.f32.mrb[15].mxu0  ;;  %v686_v6 = vpop.f32.mrb[15].mxu1  ;;  %2176 = vmatpush3.bf16.msra.mxu1 %v703_v55  ;;  %v3331_v55 = vrot.slane %v714_v52, %v3328_v53 }
 0x189   : > { %v704_v7 = vpack.c.bf16 %v622_v5, %v619_v63  ;;  %v712_v8 = vpack.c.bf16 %v686_v6, %v683_v0 }
 0x18b   : > { %2177 = vmatprep.subr.bf16.mxu1 %v712_v8 }
 0x18c   : > { %2178 = vmatpush3.bf16.msra.mxu1 %v704_v7 }
 0x18d   : > { %2179 = vmatprep.subr.bf16.mxu1 %v713_v4 }
 0x190   : > { %2180 = vmatpush3.bf16.msra.mxu1 %v705_v3 }
 0x193   : > { %912 = vmatmul.mubr.bf16.vlgmr.msra.gmra.mrb[16].mxu1 %v3205_v11 }
 0x194   : > { %919 = vmatprep.mubr.bf16.mxu1 %v3208_v13 }
 0x19b   : > { %920 = vmatmul.mubr.bf16.gmra.mrb[20].mxu1 %v3213_v14 }
 0x19c   : > { %927 = vmatprep.mubr.bf16.mxu1 %v3216_v15 }
 0x1a3   : > { %928 = vmatmul.mubr.bf16.gmra.mrb[24].mxu1 %v3221_v16 }
 0x1a4   : > { %935 = vmatprep.mubr.bf16.mxu1 %v3224_v17 }
 0x1ab   : > { %936 = vmatmul.mubr.bf16.gmra.mrb[28].mxu1 %v3229_v18 }
 0x1ac   : > { %943 = vmatprep.mubr.bf16.mxu1 %v3232_v19 }
 0x1b3   : > { %944 = vmatmul.mubr.bf16.gmra.mrb[32].mxu1 %v3237_v20 }
 0x1b4   : > { %951 = vmatprep.mubr.bf16.mxu1 %v3240_v21 }
 0x1bb   : > { %952 = vmatmul.mubr.bf16.gmra.mrb[36].mxu1 %v3245_v22 }
 0x1bc   : > { %959 = vmatprep.mubr.bf16.mxu1 %v3248_v23 }
 0x1c3   : > { %960 = vmatmul.mubr.bf16.gmra.mrb[40].mxu1 %v3253_v25 }
 0x1c4   : > { %967 = vmatprep.mubr.bf16.mxu1 %v3256_v26 }
 0x1cb   : > { %968 = vmatmul.mubr.bf16.gmra.mrb[44].mxu1 %v3261_v27 }
 0x1cc   : > { %975 = vmatprep.mubr.bf16.mxu1 %v3264_v28 }
 0x1d3   : > { %976 = vmatmul.mubr.bf16.gmra.mrb[48].mxu1 %v3269_v29 }
 0x1d4   : > { %983 = vmatprep.mubr.bf16.mxu1 %v3272_v30 }
 0x1db   : > { %984 = vmatmul.mubr.bf16.gmra.mrb[52].mxu1 %v3277_v31 }
 0x1dc   : > { %991 = vmatprep.mubr.bf16.mxu1 %v3280_v32 }
 0x1e3   : > { %992 = vmatmul.mubr.bf16.gmra.mrb[56].mxu1 %v3285_v33 }
 0x1e4   : > { %999 = vmatprep.mubr.bf16.mxu1 %v3288_v34 }
 0x1eb   : > { %1000 = vmatmul.mubr.bf16.gmra.mrb[60].mxu1 %v3293_v36 }
 0x1ec   : > { %1007 = vmatprep.mubr.bf16.mxu1 %v3296_v37 }
 0x1f3   : > { %1008 = vmatmul.mubr.bf16.gmra.mrb[64].mxu1 %v3301_v40 }
 0x1f4   : > { %1015 = vmatprep.mubr.bf16.mxu1 %v3304_v41 }
 0x1fb   : > { %1016 = vmatmul.mubr.bf16.gmra.mrb[68].mxu1 %v3309_v44 }
 0x1fc   : > { %1023 = vmatprep.mubr.bf16.mxu1 %v3312_v45 }
 0x203   : > { %1024 = vmatmul.mubr.bf16.gmra.mrb[72].mxu1 %v3317_v46 }
 0x204   : > { %1031 = vmatprep.mubr.bf16.mxu1 %v3320_v47 }
 0x20b   : > { %1032 = vmatmul.mubr.bf16.gmra.mrb[76].mxu1 %v3325_v48 }
 0x266   : > { %v2181_v54 = vpop.f32.mrb[16].mxu1 }
 0x267   : > { %v2182_v56 = vpop.f32.mrb[17].mxu1 }
 0x268   : > { %v2183_v57 = vadd.f32 %v2182_v56, %v2181_v54  ;;  %v2184_v58 = vpop.f32.mrb[18].mxu1 }
 0x269   : > { %v2185_v59 = vpop.f32.mrb[19].mxu1 }
 0x26a   : > { %v914_v60 = vadd.f32 %v2183_v57, %v3331_v55  ;;  %v2186_v61 = vadd.f32 %v2185_v59, %v2184_v58 }
 0x26c   : > { %v917_v62 = vadd.f32 %v2186_v61, %v3331_v55  ;;  %v1040_v63 = vmax.f32 %v914_v60, 0.0 }
 0x26e   : > { %v1041_v0 = vmax.f32 %v917_v62, 0.0  ;;  %v2187_v1 = vpop.f32.mrb[20].mxu1 }
 0x26f   : > { %v2188_v2 = vpop.f32.mrb[21].mxu1 }
 0x270   : > { %v2189_v3 = vadd.f32 %v2188_v2, %v2187_v1  ;;  %v2190_v4 = vpop.f32.mrb[22].mxu1  ;;  %v1072_v5 = vpack.c.bf16 %v1041_v0, %v1040_v63 }
 0x271   : > { %v2191_v6 = vpop.f32.mrb[23].mxu1 }
 0x272   : > { %v922_v7 = vadd.f32 %v2189_v3, %v3331_v55  ;;  %v2192_v8 = vadd.f32 %v2191_v6, %v2190_v4  ;;  %2504 = vmatprep.mubr.bf16.mxu0 %v1072_v5 }
 0x274   : > { %v925_v9 = vadd.f32 %v2192_v8, %v3331_v55  ;;  %v1042_v10 = vmax.f32 %v922_v7, 0.0 }
 0x276   : > { %v1043_v12 = vmax.f32 %v925_v9, 0.0  ;;  %v2193_v35 = vpop.f32.mrb[24].mxu1 }
 0x277   : > { %v2194_v38 = vpop.f32.mrb[25].mxu1 }
 0x278   : > { %v1073_v39 = vpack.c.bf16 %v1043_v12, %v1042_v10  ;;  %v2195_v42 = vadd.f32 %v2194_v38, %v2193_v35  ;;  %v2196_v43 = vpop.f32.mrb[26].mxu1 }
 0x279   : > { %v2197_v49 = vpop.f32.mrb[27].mxu1 }
 0x27a   : > { %v930_v50 = vadd.f32 %v2195_v42, %v3331_v55  ;;  %v2198_v51 = vadd.f32 %v2197_v49, %v2196_v43  ;;  %2505 = vmatmul.mubr.bf16.vlgmr.msra.gmra.mrb[16].mxu0 %v1073_v39 }
 0x27c   : > { %v933_v52 = vadd.f32 %v2198_v51, %v3331_v55  ;;  %v1044_v54 = vmax.f32 %v930_v50, 0.0 }
 0x27e   : > { %v1045_v56 = vmax.f32 %v933_v52, 0.0  ;;  %v2199_v57 = vpop.f32.mrb[28].mxu1 }
 0x27f   : > { %v2200_v58 = vpop.f32.mrb[29].mxu1 }
 0x280   : > { %v2201_v59 = vadd.f32 %v2200_v58, %v2199_v57  ;;  %v2202_v60 = vpop.f32.mrb[30].mxu1  ;;  %v1074_v61 = vpack.c.bf16 %v1045_v56, %v1044_v54 }
 0x281   : > { %v2203_v62 = vpop.f32.mrb[31].mxu1 }
 0x282   : > { %v938_v63 = vadd.f32 %v2201_v59, %v3331_v55  ;;  %v2204_v0 = vadd.f32 %v2203_v62, %v2202_v60  ;;  %2508 = vmatprep.mubr.bf16.mxu0 %v1074_v61 }
 0x284   : > { %v941_v1 = vadd.f32 %v2204_v0, %v3331_v55  ;;  %v1046_v2 = vmax.f32 %v938_v63, 0.0 }
 0x286   : > { %v1047_v3 = vmax.f32 %v941_v1, 0.0  ;;  %v2205_v4 = vpop.f32.mrb[32].mxu1 }
 0x287   : > { %v2206_v5 = vpop.f32.mrb[33].mxu1 }
 0x288   : > { %v2207_v6 = vadd.f32 %v2206_v5, %v2205_v4  ;;  %v2208_v7 = vpop.f32.mrb[34].mxu1  ;;  %v1075_v8 = vpack.c.bf16 %v1047_v3, %v1046_v2 }
 0x289   : > { %v2209_v9 = vpop.f32.mrb[35].mxu1 }
 0x28a   : > { %v946_v10 = vadd.f32 %v2207_v6, %v3331_v55  ;;  %v2210_v12 = vadd.f32 %v2209_v9, %v2208_v7  ;;  %2509 = vmatmul.mubr.bf16.gmra.mrb[20].mxu0 %v1075_v8 }
 0x28c   : > { %v949_v35 = vadd.f32 %v2210_v12, %v3331_v55  ;;  %v1048_v38 = vmax.f32 %v946_v10, 0.0 }
 0x28e   : > { %v1049_v39 = vmax.f32 %v949_v35, 0.0  ;;  %v2211_v42 = vpop.f32.mrb[36].mxu1 }
 0x28f   : > { %v2212_v43 = vpop.f32.mrb[37].mxu1 }
 0x290   : > { %v2213_v49 = vadd.f32 %v2212_v43, %v2211_v42  ;;  %v2214_v50 = vpop.f32.mrb[38].mxu1  ;;  %v1076_v51 = vpack.c.bf16 %v1049_v39, %v1048_v38 }
 0x291   : > { %v2215_v52 = vpop.f32.mrb[39].mxu1 }
 0x292   : > { %v954_v54 = vadd.f32 %v2213_v49, %v3331_v55  ;;  %v2216_v56 = vadd.f32 %v2215_v52, %v2214_v50  ;;  %2512 = vmatprep.mubr.bf16.mxu0 %v1076_v51 }
 0x294   : > { %v957_v57 = vadd.f32 %v2216_v56, %v3331_v55  ;;  %v1050_v58 = vmax.f32 %v954_v54, 0.0 }
 0x296   : > { %v1051_v59 = vmax.f32 %v957_v57, 0.0  ;;  %v2217_v60 = vpop.f32.mrb[40].mxu1 }
 0x297   : > { %v2218_v61 = vpop.f32.mrb[41].mxu1 }
 0x298   : > { %v2219_v62 = vadd.f32 %v2218_v61, %v2217_v60  ;;  %v2220_v63 = vpop.f32.mrb[42].mxu1  ;;  %v1077_v0 = vpack.c.bf16 %v1051_v59, %v1050_v58 }
 0x299   : > { %v2221_v1 = vpop.f32.mrb[43].mxu1 }
 0x29a   : > { %v962_v2 = vadd.f32 %v2219_v62, %v3331_v55  ;;  %v2222_v3 = vadd.f32 %v2221_v1, %v2220_v63  ;;  %2513 = vmatmul.mubr.bf16.gmra.mrb[24].mxu0 %v1077_v0 }
 0x29c   : > { %v965_v4 = vadd.f32 %v2222_v3, %v3331_v55  ;;  %v1052_v5 = vmax.f32 %v962_v2, 0.0 }
 0x29e   : > { %v1053_v6 = vmax.f32 %v965_v4, 0.0  ;;  %v2223_v7 = vpop.f32.mrb[44].mxu1 }
 0x29f   : > { %v2224_v8 = vpop.f32.mrb[45].mxu1 }
 0x2a0   : > { %v2225_v9 = vadd.f32 %v2224_v8, %v2223_v7  ;;  %v2226_v10 = vpop.f32.mrb[46].mxu1  ;;  %v1078_v12 = vpack.c.bf16 %v1053_v6, %v1052_v5 }
 0x2a1   : > { %v2227_v35 = vpop.f32.mrb[47].mxu1 }
 0x2a2   : > { %v970_v38 = vadd.f32 %v2225_v9, %v3331_v55  ;;  %v2228_v39 = vadd.f32 %v2227_v35, %v2226_v10  ;;  %2516 = vmatprep.mubr.bf16.mxu0 %v1078_v12 }
 0x2a4   : > { %v973_v42 = vadd.f32 %v2228_v39, %v3331_v55  ;;  %v1054_v43 = vmax.f32 %v970_v38, 0.0 }
 0x2a6   : > { %v1055_v49 = vmax.f32 %v973_v42, 0.0  ;;  %v2229_v50 = vpop.f32.mrb[48].mxu1 }
 0x2a7   : > { %v2230_v51 = vpop.f32.mrb[49].mxu1 }
 0x2a8   : > { %v2231_v52 = vadd.f32 %v2230_v51, %v2229_v50  ;;  %v2232_v54 = vpop.f32.mrb[50].mxu1  ;;  %v1079_v56 = vpack.c.bf16 %v1055_v49, %v1054_v43 }
 0x2a9   : > { %v2233_v57 = vpop.f32.mrb[51].mxu1 }
 0x2aa   : > { %v978_v58 = vadd.f32 %v2231_v52, %v3331_v55  ;;  %v2234_v59 = vadd.f32 %v2233_v57, %v2232_v54  ;;  %2517 = vmatmul.mubr.bf16.gmra.mrb[28].mxu0 %v1079_v56 }
 0x2ac   : > { %v981_v60 = vadd.f32 %v2234_v59, %v3331_v55  ;;  %v1056_v61 = vmax.f32 %v978_v58, 0.0 }
 0x2ae   : > { %v1057_v62 = vmax.f32 %v981_v60, 0.0  ;;  %v2235_v63 = vpop.f32.mrb[52].mxu1 }
 0x2af   : > { %v2236_v0 = vpop.f32.mrb[53].mxu1 }
 0x2b0   : > { %v2237_v1 = vadd.f32 %v2236_v0, %v2235_v63  ;;  %v2238_v2 = vpop.f32.mrb[54].mxu1  ;;  %v1080_v3 = vpack.c.bf16 %v1057_v62, %v1056_v61 }
 0x2b1   : > { %v2239_v4 = vpop.f32.mrb[55].mxu1 }
 0x2b2   : > { %v986_v5 = vadd.f32 %v2237_v1, %v3331_v55  ;;  %v2240_v6 = vadd.f32 %v2239_v4, %v2238_v2  ;;  %2520 = vmatprep.mubr.bf16.mxu0 %v1080_v3 }
 0x2b4   : > { %v989_v7 = vadd.f32 %v2240_v6, %v3331_v55  ;;  %v1058_v8 = vmax.f32 %v986_v5, 0.0 }
 0x2b6   : > { %v1059_v9 = vmax.f32 %v989_v7, 0.0  ;;  %v2241_v10 = vpop.f32.mrb[56].mxu1 }
 0x2b7   : > { %v2242_v12 = vpop.f32.mrb[57].mxu1 }
 0x2b8   : > { %v2243_v35 = vadd.f32 %v2242_v12, %v2241_v10  ;;  %v2244_v38 = vpop.f32.mrb[58].mxu1  ;;  %v1081_v39 = vpack.c.bf16 %v1059_v9, %v1058_v8 }
 0x2b9   : > { %v2245_v42 = vpop.f32.mrb[59].mxu1 }
 0x2ba   : > { %v994_v43 = vadd.f32 %v2243_v35, %v3331_v55  ;;  %v2246_v49 = vadd.f32 %v2245_v42, %v2244_v38  ;;  %2521 = vmatmul.mubr.bf16.gmra.mrb[32].mxu0 %v1081_v39 }
 0x2bc   : > { %v997_v50 = vadd.f32 %v2246_v49, %v3331_v55  ;;  %v1060_v51 = vmax.f32 %v994_v43, 0.0 }
 0x2be   : > { %v1061_v52 = vmax.f32 %v997_v50, 0.0  ;;  %v2247_v54 = vpop.f32.mrb[60].mxu1 }
 0x2bf   : > { %v2248_v56 = vpop.f32.mrb[61].mxu1 }
 0x2c0   : > { %v2249_v57 = vadd.f32 %v2248_v56, %v2247_v54  ;;  %v2250_v58 = vpop.f32.mrb[62].mxu1  ;;  %v1082_v59 = vpack.c.bf16 %v1061_v52, %v1060_v51 }
 0x2c1   : > { %v2251_v60 = vpop.f32.mrb[63].mxu1 }
 0x2c2   : > { %v1002_v61 = vadd.f32 %v2249_v57, %v3331_v55  ;;  %v2252_v62 = vadd.f32 %v2251_v60, %v2250_v58  ;;  %2524 = vmatprep.mubr.bf16.mxu0 %v1082_v59 }
 0x2c4   : > { %v1005_v63 = vadd.f32 %v2252_v62, %v3331_v55  ;;  %v1062_v0 = vmax.f32 %v1002_v61, 0.0 }
 0x2c6   : > { %v1063_v1 = vmax.f32 %v1005_v63, 0.0  ;;  %v2253_v2 = vpop.f32.mrb[64].mxu1 }
 0x2c7   : > { %v2254_v3 = vpop.f32.mrb[65].mxu1 }
 0x2c8   : > { %v2255_v4 = vadd.f32 %v2254_v3, %v2253_v2  ;;  %v2256_v5 = vpop.f32.mrb[66].mxu1  ;;  %v1083_v6 = vpack.c.bf16 %v1063_v1, %v1062_v0 }
 0x2c9   : > { %v2257_v7 = vpop.f32.mrb[67].mxu1 }
 0x2ca   : > { %v1010_v8 = vadd.f32 %v2255_v4, %v3331_v55  ;;  %v2258_v9 = vadd.f32 %v2257_v7, %v2256_v5  ;;  %2525 = vmatmul.mubr.bf16.gmra.mrb[36].mxu0 %v1083_v6 }
 0x2cc   : > { %v1013_v10 = vadd.f32 %v2258_v9, %v3331_v55  ;;  %v1064_v12 = vmax.f32 %v1010_v8, 0.0 }
 0x2ce   : > { %v1065_v35 = vmax.f32 %v1013_v10, 0.0  ;;  %v2259_v38 = vpop.f32.mrb[68].mxu1 }
 0x2cf   : > { %v2260_v39 = vpop.f32.mrb[69].mxu1 }
 0x2d0   : > { %v2261_v42 = vadd.f32 %v2260_v39, %v2259_v38  ;;  %v2262_v43 = vpop.f32.mrb[70].mxu1  ;;  %v1084_v49 = vpack.c.bf16 %v1065_v35, %v1064_v12 }
 0x2d1   : > { %v2263_v50 = vpop.f32.mrb[71].mxu1 }
 0x2d2   : > { %v1018_v51 = vadd.f32 %v2261_v42, %v3331_v55  ;;  %v2264_v52 = vadd.f32 %v2263_v50, %v2262_v43  ;;  %2528 = vmatprep.mubr.bf16.mxu0 %v1084_v49 }
 0x2d4   : > { %v1021_v54 = vadd.f32 %v2264_v52, %v3331_v55  ;;  %v1066_v56 = vmax.f32 %v1018_v51, 0.0 }
 0x2d6   : > { %v1067_v57 = vmax.f32 %v1021_v54, 0.0  ;;  %v2265_v58 = vpop.f32.mrb[72].mxu1 }
 0x2d7   : > { %v2266_v59 = vpop.f32.mrb[73].mxu1 }
 0x2d8   : > { %v2267_v60 = vadd.f32 %v2266_v59, %v2265_v58  ;;  %v2268_v61 = vpop.f32.mrb[74].mxu1  ;;  %v1085_v62 = vpack.c.bf16 %v1067_v57, %v1066_v56 }
 0x2d9   : > { %v2269_v63 = vpop.f32.mrb[75].mxu1 }
 0x2da   : > { %v1026_v0 = vadd.f32 %v2267_v60, %v3331_v55  ;;  %v2270_v1 = vadd.f32 %v2269_v63, %v2268_v61  ;;  %2529 = vmatmul.mubr.bf16.gmra.mrb[40].mxu0 %v1085_v62 }
 0x2dc   : > { %v1029_v2 = vadd.f32 %v2270_v1, %v3331_v55  ;;  %v1068_v3 = vmax.f32 %v1026_v0, 0.0 }
 0x2de   : > { %v1069_v4 = vmax.f32 %v1029_v2, 0.0  ;;  %v2271_v5 = vpop.f32.mrb[76].mxu1 }
 0x2df   : > { %v2272_v6 = vpop.f32.mrb[77].mxu1 }
 0x2e0   : > { %v2273_v7 = vadd.f32 %v2272_v6, %v2271_v5  ;;  %v2274_v8 = vpop.f32.mrb[78].mxu1  ;;  %v1086_v9 = vpack.c.bf16 %v1069_v4, %v1068_v3 }
 0x2e1   : > { %v2275_v10 = vpop.f32.mrb[79].mxu1 }
 0x2e2   : > { %v1034_v12 = vadd.f32 %v2273_v7, %v3331_v55  ;;  %v2276_v35 = vadd.f32 %v2275_v10, %v2274_v8  ;;  %2532 = vmatprep.mubr.bf16.mxu0 %v1086_v9 }
 0x2e4   : > { %v1037_v38 = vadd.f32 %v2276_v35, %v3331_v55  ;;  %v1070_v39 = vmax.f32 %v1034_v12, 0.0 }
 0x2e6   : > { %v1071_v42 = vmax.f32 %v1037_v38, 0.0 }
 0x2e8   : > { %v1087_v43 = vpack.c.bf16 %v1071_v42, %v1070_v39 }
 0x2ea   : > { %2533 = vmatmul.mubr.bf16.gmra.mrb[44].mxu0 %v1087_v43 }
 0x2eb   : > { %1350 = vmatprep.mubr.bf16.mxu0 %v3201_v24 }
 0x34d   : > { %v2506_v49 = vpop.f32.mrb[16].mxu0 }
 0x34e   : > { %v1170_v50 = vpop.f32.mrb[17].mxu0 }
 0x34f   : > { %v2507_v51 = vpop.f32.mrb[18].mxu0 }
 0x350   : > { %v1298_v52 = vpack.c.bf16 %v2507_v51, %v2506_v49  ;;  %v1173_v54 = vpop.f32.mrb[19].mxu0 }
 0x351   : > { %v1297_v56 = vpack.c.bf16 %v1173_v54, %v1170_v50 }
 0x35d   : > { %v2510_v57 = vpop.f32.mrb[20].mxu0 }
 0x35e   : > { %v1186_v58 = vpop.f32.mrb[21].mxu0 }
 0x35f   : > { %v2511_v59 = vpop.f32.mrb[22].mxu0 }
 0x360   : > { %v1300_v60 = vpack.c.bf16 %v2511_v59, %v2510_v57  ;;  %v1189_v61 = vpop.f32.mrb[23].mxu0 }
 0x361   : > { %v1299_v62 = vpack.c.bf16 %v1189_v61, %v1186_v58 }
 0x36d   : > { %v2514_v63 = vpop.f32.mrb[24].mxu0 }
 0x36e   : > { %v1202_v55 = vpop.f32.mrb[25].mxu0 }
 0x36f   : > { %v2515_v0 = vpop.f32.mrb[26].mxu0 }
 0x370   : > { %v1302_v1 = vpack.c.bf16 %v2515_v0, %v2514_v63  ;;  %v1205_v2 = vpop.f32.mrb[27].mxu0 }
 0x371   : > { %v1301_v3 = vpack.c.bf16 %v1205_v2, %v1202_v55 }
 0x37d   : > { %v2518_v4 = vpop.f32.mrb[28].mxu0 }
 0x37e   : > { %v1218_v24 = vpop.f32.mrb[29].mxu0 }
 0x37f   : > { %v2519_v5 = vpop.f32.mrb[30].mxu0 }
 0x380   : > { %v1304_v6 = vpack.c.bf16 %v2519_v5, %v2518_v4  ;;  %v1221_v7 = vpop.f32.mrb[31].mxu0 }
 0x381   : > { %v1303_v8 = vpack.c.bf16 %v1221_v7, %v1218_v24 }
 0x38d   : > { %v2522_v9 = vpop.f32.mrb[32].mxu0 }
 0x38e   : > { %v1234_v10 = vpop.f32.mrb[33].mxu0 }
 0x38f   : > { %v2523_v12 = vpop.f32.mrb[34].mxu0 }
 0x390   : > { %v1306_v35 = vpack.c.bf16 %v2523_v12, %v2522_v9  ;;  %v1237_v38 = vpop.f32.mrb[35].mxu0 }
 0x391   : > { %v1305_v39 = vpack.c.bf16 %v1237_v38, %v1234_v10 }
 0x393   : > { %2301 = vmatprep.subr.bf16.mxu0 %v1305_v39 }
 0x394   : > { %2302 = vmatpush3.bf16.msra.mxu0 %v1297_v56 }
 0x395   : > { %2303 = vmatprep.subr.bf16.mxu0 %v1306_v35  ;;  %v2767_v35 = vld [vmem:[#allocation7 + $0xc0] sm:$0xff]  }
 0x398   : > { %2304 = vmatpush3.bf16.msra.mxu0 %v1298_v52 }
 0x39d   : > { %v2526_v42 = vpop.f32.mrb[36].mxu0 }
 0x39e   : > { %v1250_v43 = vpop.f32.mrb[37].mxu0 }
 0x39f   : > { %v2527_v49 = vpop.f32.mrb[38].mxu0 }
 0x3a0   : > { %v1308_v50 = vpack.c.bf16 %v2527_v49, %v2526_v42  ;;  %v1253_v51 = vpop.f32.mrb[39].mxu0 }
 0x3a1   : > { %v1307_v54 = vpack.c.bf16 %v1253_v51, %v1250_v43 }
 0x3a3   : > { %2305 = vmatprep.subr.bf16.mxu0 %v1307_v54 }
 0x3a4   : > { %2306 = vmatpush3.bf16.msra.mxu0 %v1299_v62 }
 0x3a5   : > { %2307 = vmatprep.subr.bf16.mxu0 %v1308_v50 }
 0x3a8   : > { %2308 = vmatpush3.bf16.msra.mxu0 %v1300_v60 }
 0x3ad   : > { %v2530_v57 = vpop.f32.mrb[40].mxu0 }
 0x3ae   : > { %v1266_v58 = vpop.f32.mrb[41].mxu0 }
 0x3af   : > { %v2531_v59 = vpop.f32.mrb[42].mxu0 }
 0x3b0   : > { %v1310_v61 = vpack.c.bf16 %v2531_v59, %v2530_v57  ;;  %v1269_v63 = vpop.f32.mrb[43].mxu0 }
 0x3b1   : > { %v1309_v55 = vpack.c.bf16 %v1269_v63, %v1266_v58 }
 0x3b3   : > { %2309 = vmatprep.subr.bf16.mxu0 %v1309_v55 }
 0x3b4   : > { %2310 = vmatpush3.bf16.msra.mxu0 %v1301_v3 }
 0x3b5   : > { %2311 = vmatprep.subr.bf16.mxu0 %v1310_v61 }
 0x3b8   : > { %2312 = vmatpush3.bf16.msra.mxu0 %v1302_v1  ;;  %v2766_v1 = vld [vmem:[#allocation7 + $0xb8] sm:$0xff]  }
 0x3bd   : > { %v2534_v52 = vpop.f32.mrb[44].mxu0 }
 0x3be   : > { %v1282_v56 = vpop.f32.mrb[45].mxu0 }
 0x3bf   : > { %v2535_v0 = vpop.f32.mrb[46].mxu0 }
 0x3c0   : > { %v1312_v2 = vpack.c.bf16 %v2535_v0, %v2534_v52  ;;  %v1285_v4 = vpop.f32.mrb[47].mxu0 }
 0x3c1   : > { %v1311_v24 = vpack.c.bf16 %v1285_v4, %v1282_v56 }
 0x3c3   : > { %2313 = vmatprep.subr.bf16.mxu0 %v1311_v24 }
 0x3c4   : > { %2314 = vmatpush3.bf16.msra.mxu0 %v1303_v8 }
 0x3c5   : > { %2315 = vmatprep.subr.bf16.mxu0 %v1312_v2 }
 0x3c8   : > { %2316 = vmatpush3.bf16.msra.mxu0 %v1304_v6 }
 0x3cb   : > { %1351 = vmatmul.mubr.bf16.vlgmr.msra.gmra.mrb[48].mxu0 %v3205_v11  ;;  %v2760_v11 = vld [vmem:[#allocation7 + $0x88] sm:$0xff]  }
 0x3cc   : > { %1358 = vmatprep.mubr.bf16.mxu0 %v3208_v13  ;;  %v2955_v13 = vmov 0.0  }
 0x3cd   : > { %2536 = vmatprep.subr.bf16.mxu1 %v2955_v13  ;;  %2552 = vmatprep.mubr.msk.bf16.mxu1 %vm2956_vm0, %v2955_v13 }
 0x3ce   : > { %2537 = vmatpush3.bf16.msra.mxu1 %v2760_v11 }
 0x3cf   : > { %2538 = vmatprep.subr.bf16.mxu1 %v2955_v13 }
 0x3d3   : > { %1359 = vmatmul.mubr.bf16.gmra.mrb[52].mxu0 %v3213_v14  ;;  %v2761_v14 = vld [vmem:[#allocation7 + $0x90] sm:$0xff]  }
 0x3d4   : > { %1366 = vmatprep.mubr.bf16.mxu0 %v3216_v15  ;;  %2539 = vmatpush3.bf16.msra.mxu1 %v2761_v14  ;;  %v2762_v15 = vld [vmem:[#allocation7 + $0x98] sm:$0xff]  }
 0x3d5   : > { %2540 = vmatprep.subr.bf16.mxu1 %v2955_v13 }
 0x3d8   : > { %2541 = vmatpush3.bf16.msra.mxu1 %v2762_v15 }
 0x3d9   : > { %2542 = vmatprep.subr.bf16.mxu1 %v2955_v13 }
 0x3db   : > { %1367 = vmatmul.mubr.bf16.gmra.mrb[56].mxu0 %v3221_v16  ;;  %v2763_v16 = vld [vmem:[#allocation7 + $0xa0] sm:$0xff]  }
 0x3dc   : > { %1374 = vmatprep.mubr.bf16.mxu0 %v3224_v17  ;;  %2543 = vmatpush3.bf16.msra.mxu1 %v2763_v16  ;;  %v2764_v17 = vld [vmem:[#allocation7 + $0xa8] sm:$0xff]  }
 0x3dd   : > { %2544 = vmatprep.subr.bf16.mxu1 %v2955_v13 }
 0x3e0   : > { %2545 = vmatpush3.bf16.msra.mxu1 %v2764_v17 }
 0x3e1   : > { %2546 = vmatprep.subr.bf16.mxu1 %v2955_v13 }
 0x3e3   : > { %1375 = vmatmul.mubr.bf16.gmra.mrb[60].mxu0 %v3229_v18  ;;  %v341_v18 = vld [vmem:[#allocation7 + $0x84] sm:$0x1] }
 0x3e4   : > { %1382 = vmatprep.mubr.bf16.mxu0 %v3232_v19  ;;  %v1313_v19 = vunpack.c.l.bf16 %v341_v18 }
 0x3eb   : > { %1383 = vmatmul.mubr.bf16.gmra.mrb[64].mxu0 %v3237_v20 }
 0x3ec   : > { %1390 = vmatprep.mubr.bf16.mxu0 %v3240_v21  ;;  %v3404_v21 = vrot.slane %v1313_v19, %v3328_v53 }
 0x3f3   : > { %1391 = vmatmul.mubr.bf16.gmra.mrb[68].mxu0 %v3245_v22 }
 0x3f4   : > { %1398 = vmatprep.mubr.bf16.mxu0 %v3248_v23 }
 0x3fb   : > { %1399 = vmatmul.mubr.bf16.gmra.mrb[72].mxu0 %v3253_v25 }
 0x3fc   : > { %1406 = vmatprep.mubr.bf16.mxu0 %v3256_v26 }
 0x403   : > { %1407 = vmatmul.mubr.bf16.gmra.mrb[76].mxu0 %v3261_v27 }
 0x404   : > { %1414 = vmatprep.mubr.bf16.mxu0 %v3264_v28 }
 0x40b   : > { %1415 = vmatmul.mubr.bf16.gmra.mrb[80].mxu0 %v3269_v29  ;;  %v2765_v29 = vld [vmem:[#allocation7 + $0xb0] sm:$0xff]  }
 0x40c   : > { %1422 = vmatprep.mubr.bf16.mxu0 %v3272_v30  ;;  %2547 = vmatpush3.bf16.msra.mxu1 %v2765_v29 }
 0x40d   : > { %2548 = vmatprep.subr.bf16.mxu1 %v2955_v13 }
 0x410   : > { %2549 = vmatpush3.bf16.msra.mxu1 %v2766_v1 }
 0x411   : > { %2550 = vmatprep.subr.bf16.mxu1 %v2955_v13 }
 0x413   : > { %1423 = vmatmul.mubr.bf16.gmra.mrb[84].mxu0 %v3277_v31 }
 0x414   : > { %1430 = vmatprep.mubr.bf16.mxu0 %v3280_v32  ;;  %2551 = vmatpush3.bf16.msra.mxu1 %v2767_v35 }
 0x415   : > { %2556 = vmatprep.subr.bf16.mxu1 %v2955_v13 }
 0x41b   : > { %1431 = vmatmul.mubr.bf16.gmra.mrb[88].mxu0 %v3285_v33 }
 0x41c   : > { %1438 = vmatprep.mubr.bf16.mxu0 %v3288_v34 }
 0x423   : > { %1439 = vmatmul.mubr.bf16.gmra.mrb[92].mxu0 %v3293_v36 }
 0x424   : > { %1446 = vmatprep.mubr.bf16.mxu0 %v3296_v37 }
 0x42b   : > { %1447 = vmatmul.mubr.bf16.gmra.mrb[96].mxu0 %v3301_v40 }
 0x42c   : > { %1454 = vmatprep.mubr.bf16.mxu0 %v3304_v41 }
 0x433   : > { %1455 = vmatmul.mubr.bf16.gmra.mrb[100].mxu0 %v3309_v44 }
 0x434   : > { %1462 = vmatprep.mubr.bf16.mxu0 %v3312_v45 }
 0x43b   : > { %1463 = vmatmul.mubr.bf16.gmra.mrb[104].mxu0 %v3317_v46 }
 0x43c   : > { %1470 = vmatprep.mubr.bf16.mxu0 %v3320_v47 }
 0x443   : > { %1471 = vmatmul.mubr.bf16.gmra.mrb[108].mxu0 %v3325_v48 }
 0x49e   : > { %v2317_v20 = vpop.f32.mrb[48].mxu0 }
 0x49f   : > { %v2318_v22 = vpop.f32.mrb[49].mxu0 }
 0x4a0   : > { %v2319_v23 = vadd.f32 %v2318_v22, %v2317_v20  ;;  %v2320_v25 = vpop.f32.mrb[50].mxu0 }
 0x4a1   : > { %v2321_v26 = vpop.f32.mrb[51].mxu0 }
 0x4a2   : > { %v1353_v27 = vadd.f32 %v2319_v23, %v3404_v21  ;;  %v2322_v28 = vadd.f32 %v2321_v26, %v2320_v25 }
 0x4a4   : > { %v1356_v30 = vadd.f32 %v2322_v28, %v3404_v21  ;;  %v1479_v31 = vmax.f32 %v1353_v27, 0.0 }
 0x4a6   : > { %v1480_v32 = vmax.f32 %v1356_v30, 0.0  ;;  %v2323_v33 = vpop.f32.mrb[52].mxu0 }
 0x4a7   : > { %v2324_v34 = vpop.f32.mrb[53].mxu0 }
 0x4a8   : > { %v1511_v36 = vadd.f32 %v1480_v32, %v1479_v31  ;;  %v2325_v37 = vadd.f32 %v2324_v34, %v2323_v33  ;;  %v2326_v40 = vpop.f32.mrb[54].mxu0 }
 0x4a9   : > { %v2327_v41 = vpop.f32.mrb[55].mxu0 }
 0x4aa   : > { %v1361_v44 = vadd.f32 %v2325_v37, %v3404_v21  ;;  %v2328_v45 = vadd.f32 %v2327_v41, %v2326_v40 }
 0x4ac   : > { %v1481_v46 = vmax.f32 %v1361_v44, 0.0  ;;  %v1364_v47 = vadd.f32 %v2328_v45, %v3404_v21 }
 0x4ae   : > { %v1512_v48 = vadd.f32 %v1511_v36, %v1481_v46  ;;  %v1482_v60 = vmax.f32 %v1364_v47, 0.0  ;;  %v2329_v62 = vpop.f32.mrb[56].mxu0 }
 0x4af   : > { %v2330_v3 = vpop.f32.mrb[57].mxu0 }
 0x4b0   : > { %v1513_v5 = vadd.f32 %v1512_v48, %v1482_v60  ;;  %v2331_v6 = vadd.f32 %v2330_v3, %v2329_v62  ;;  %v2332_v7 = vpop.f32.mrb[58].mxu0 }
 0x4b1   : > { %v2333_v8 = vpop.f32.mrb[59].mxu0 }
 0x4b2   : > { %v1514_v9 = vrot.slane %v1513_v5, 4  ;;  %v1369_v10 = vadd.f32 %v2331_v6, %v3404_v21  ;;  %v2334_v12 = vadd.f32 %v2333_v8, %v2332_v7 }
 0x4b4   : > { %v1372_v38 = vadd.f32 %v2334_v12, %v3404_v21  ;;  %v1515_v39 = vadd.f32 %v1514_v9, %v1513_v5  ;;  %v1483_v42 = vmax.f32 %v1369_v10, 0.0 }
 0x4b6   : > { %v1484_v43 = vmax.f32 %v1372_v38, 0.0  ;;  %v2335_v49 = vpop.f32.mrb[60].mxu0  ;;  %v1516_v58 = vrot.slane %v1515_v39, 2 }
 0x4b7   : > { %v2336_v50 = vpop.f32.mrb[61].mxu0 }
 0x4b8   : > { %v1520_v51 = vadd.f32 %v1484_v43, %v1483_v42  ;;  %v2337_v54 = vadd.f32 %v2336_v50, %v2335_v49  ;;  %v2338_v57 = vpop.f32.mrb[62].mxu0  ;;  %v1517_v56 = vadd.f32 %v1516_v58, %v1515_v39 }
 0x4b9   : > { %v2339_v59 = vpop.f32.mrb[63].mxu0 }
 0x4ba   : > { %v1377_v61 = vadd.f32 %v2337_v54, %v3404_v21  ;;  %v2340_v63 = vadd.f32 %v2339_v59, %v2338_v57  ;;  %v1518_v16 = vrot.slane %v1517_v56, 1 }
 0x4bc   : > { %v1485_v55 = vmax.f32 %v1377_v61, 0.0  ;;  %v1380_v52 = vadd.f32 %v2340_v63, %v3404_v21  ;;  %v1519_v25 = vadd.f32 %v1518_v16, %v1517_v56 }
 0x4be   : > { %v1521_v0 = vadd.f32 %v1520_v51, %v1485_v55  ;;  %v1486_v2 = vmax.f32 %v1380_v52, 0.0  ;;  %v2341_v4 = vpop.f32.mrb[64].mxu0  ;;  %v1584_v36 = vmul.f32 0.03125, %v1519_v25 }
 0x4bf   : > { %v2342_v24 = vpop.f32.mrb[65].mxu0 }
 0x4c0   : > { %v1522_v11 = vadd.f32 %v1521_v0, %v1486_v2  ;;  %v2343_v14 = vadd.f32 %v2342_v24, %v2341_v4  ;;  %v2344_v15 = vpop.f32.mrb[66].mxu0  ;;  %v1592_v48 = vpack.c.bf16 %v1584_v36, %v1584_v36 }
 0x4c1   : > { %v2345_v17 = vpop.f32.mrb[67].mxu0 }
 0x4c2   : > { %v1523_v18 = vrot.slane %v1522_v11, 4  ;;  %v1385_v19 = vadd.f32 %v2343_v14, %v3404_v21  ;;  %v2346_v20 = vadd.f32 %v2345_v17, %v2344_v15  ;;  %v1613_v10 = vunpack.c.l.b16 %v1592_v48 }
 0x4c4   : > { %v1524_v22 = vadd.f32 %v1523_v18, %v1522_v11  ;;  %v1388_v23 = vadd.f32 %v2346_v20, %v3404_v21  ;;  %v1487_v27 = vmax.f32 %v1385_v19, 0.0 }
 0x4c6   : > { %v1525_v26 = vrot.slane %v1524_v22, 2  ;;  %v1488_v28 = vmax.f32 %v1388_v23, 0.0  ;;  %v2347_v29 = vpop.f32.mrb[68].mxu0 }
 0x4c7   : > { %v2348_v30 = vpop.f32.mrb[69].mxu0 }
 0x4c8   : > { %v1526_v31 = vadd.f32 %v1525_v26, %v1524_v22  ;;  %v1529_v32 = vadd.f32 %v1488_v28, %v1487_v27  ;;  %v2349_v33 = vadd.f32 %v2348_v30, %v2347_v29  ;;  %v2350_v34 = vpop.f32.mrb[70].mxu0 }
 0x4c9   : > { %v2351_v37 = vpop.f32.mrb[71].mxu0 }
 0x4ca   : > { %v1527_v40 = vrot.slane %v1526_v31, 1  ;;  %v1393_v41 = vadd.f32 %v2349_v33, %v3404_v21  ;;  %v2352_v44 = vadd.f32 %v2351_v37, %v2350_v34 }
 0x4cc   : > { %v1528_v45 = vadd.f32 %v1527_v40, %v1526_v31  ;;  %v1489_v46 = vmax.f32 %v1393_v41, 0.0  ;;  %v1396_v47 = vadd.f32 %v2352_v44, %v3404_v21 }
 0x4ce   : > { %v1585_v60 = vmul.f32 0.03125, %v1528_v45  ;;  %v1530_v62 = vadd.f32 %v1529_v32, %v1489_v46  ;;  %v1490_v1 = vmax.f32 %v1396_v47, 0.0  ;;  %v2353_v3 = vpop.f32.mrb[72].mxu0 }
 0x4cf   : > { %v2354_v5 = vpop.f32.mrb[73].mxu0 }
 0x4d0   : > { %v1593_v6 = vpack.c.bf16 %v1585_v60, %v1585_v60  ;;  %v1531_v7 = vadd.f32 %v1530_v62, %v1490_v1  ;;  %v2355_v8 = vadd.f32 %v2354_v5, %v2353_v3  ;;  %v2356_v9 = vpop.f32.mrb[74].mxu0 }
 0x4d1   : > { %v2357_v12 = vpop.f32.mrb[75].mxu0 }
 0x4d2   : > { %v1614_v35 = vunpack.c.l.b16 %v1593_v6  ;;  %v1532_v38 = vrot.slane %v1531_v7, 4  ;;  %v1401_v39 = vadd.f32 %v2355_v8, %v3404_v21  ;;  %v2358_v42 = vadd.f32 %v2357_v12, %v2356_v9 }
 0x4d4   : > { %v1622_v43 = vsel %vm1621_vm1, %v1614_v35, %v1613_v10  ;;  %v1533_v49 = vadd.f32 %v1532_v38, %v1531_v7  ;;  %v1404_v50 = vadd.f32 %v2358_v42, %v3404_v21  ;;  %v1491_v54 = vmax.f32 %v1401_v39, 0.0 }
 0x4d6   : > { %v1534_v51 = vrot.slane %v1533_v49, 2  ;;  %v1492_v57 = vmax.f32 %v1404_v50, 0.0  ;;  %v2359_v58 = vpop.f32.mrb[76].mxu0 }
 0x4d7   : > { %v2360_v59 = vpop.f32.mrb[77].mxu0 }
 0x4d8   : > { %v1535_v61 = vadd.f32 %v1534_v51, %v1533_v49  ;;  %v1538_v63 = vadd.f32 %v1492_v57, %v1491_v54  ;;  %v2361_v55 = vadd.f32 %v2360_v59, %v2359_v58  ;;  %v2362_v52 = vpop.f32.mrb[78].mxu0 }
 0x4d9   : > { %v2363_v56 = vpop.f32.mrb[79].mxu0 }
 0x4da   : > { %v1536_v0 = vrot.slane %v1535_v61, 1  ;;  %v1409_v2 = vadd.f32 %v2361_v55, %v3404_v21  ;;  %v2364_v4 = vadd.f32 %v2363_v56, %v2362_v52 }
 0x4dc   : > { %v1537_v24 = vadd.f32 %v1536_v0, %v1535_v61  ;;  %v1493_v11 = vmax.f32 %v1409_v2, 0.0  ;;  %v1412_v14 = vadd.f32 %v2364_v4, %v3404_v21 }
 0x4de   : > { %v1586_v15 = vmul.f32 0.03125, %v1537_v24  ;;  %v1539_v16 = vadd.f32 %v1538_v63, %v1493_v11  ;;  %v1494_v17 = vmax.f32 %v1412_v14, 0.0  ;;  %v2365_v18 = vpop.f32.mrb[80].mxu0 }
 0x4df   : > { %v2366_v19 = vpop.f32.mrb[81].mxu0 }
 0x4e0   : > { %v1594_v20 = vpack.c.bf16 %v1586_v15, %v1586_v15  ;;  %v1540_v22 = vadd.f32 %v1539_v16, %v1494_v17  ;;  %v2367_v23 = vadd.f32 %v2366_v19, %v2365_v18  ;;  %v2368_v25 = vpop.f32.mrb[82].mxu0 }
 0x4e1   : > { %v2369_v26 = vpop.f32.mrb[83].mxu0 }
 0x4e2   : > { %v1615_v27 = vunpack.c.l.b16 %v1594_v20  ;;  %v1541_v28 = vrot.slane %v1540_v22, 4  ;;  %v1417_v29 = vadd.f32 %v2367_v23, %v3404_v21  ;;  %v2370_v30 = vadd.f32 %v2369_v26, %v2368_v25 }
 0x4e4   : > { %v1624_v31 = vsel %vm1623_vm2, %v1615_v27, %v1622_v43  ;;  %v1542_v32 = vadd.f32 %v1541_v28, %v1540_v22  ;;  %v1420_v33 = vadd.f32 %v2370_v30, %v3404_v21  ;;  %v1495_v36 = vmax.f32 %v1417_v29, 0.0 }
 0x4e6   : > { %v1543_v34 = vrot.slane %v1542_v32, 2  ;;  %v1496_v37 = vmax.f32 %v1420_v33, 0.0  ;;  %v2371_v40 = vpop.f32.mrb[84].mxu0 }
 0x4e7   : > { %v2372_v41 = vpop.f32.mrb[85].mxu0 }
 0x4e8   : > { %v1544_v44 = vadd.f32 %v1543_v34, %v1542_v32  ;;  %v1547_v45 = vadd.f32 %v1496_v37, %v1495_v36  ;;  %v2373_v46 = vadd.f32 %v2372_v41, %v2371_v40  ;;  %v2374_v47 = vpop.f32.mrb[86].mxu0 }
 0x4e9   : > { %v2375_v48 = vpop.f32.mrb[87].mxu0 }
 0x4ea   : > { %v1545_v60 = vrot.slane %v1544_v44, 1  ;;  %v1425_v62 = vadd.f32 %v2373_v46, %v3404_v21  ;;  %v2376_v1 = vadd.f32 %v2375_v48, %v2374_v47 }
 0x4ec   : > { %v1546_v3 = vadd.f32 %v1545_v60, %v1544_v44  ;;  %v1497_v5 = vmax.f32 %v1425_v62, 0.0  ;;  %v1428_v6 = vadd.f32 %v2376_v1, %v3404_v21 }
 0x4ee   : > { %v1587_v7 = vmul.f32 0.03125, %v1546_v3  ;;  %v1548_v8 = vadd.f32 %v1547_v45, %v1497_v5  ;;  %v1498_v9 = vmax.f32 %v1428_v6, 0.0  ;;  %v2377_v10 = vpop.f32.mrb[88].mxu0 }
 0x4ef   : > { %v2378_v12 = vpop.f32.mrb[89].mxu0 }
 0x4f0   : > { %v1595_v35 = vpack.c.bf16 %v1587_v7, %v1587_v7  ;;  %v1549_v38 = vadd.f32 %v1548_v8, %v1498_v9  ;;  %v2379_v39 = vadd.f32 %v2378_v12, %v2377_v10  ;;  %v2380_v42 = vpop.f32.mrb[90].mxu0 }
 0x4f1   : > { %v2381_v43 = vpop.f32.mrb[91].mxu0 }
 0x4f2   : > { %v1616_v49 = vunpack.c.l.b16 %v1595_v35  ;;  %v1550_v50 = vrot.slane %v1549_v38, 4  ;;  %v1433_v51 = vadd.f32 %v2379_v39, %v3404_v21  ;;  %v2382_v54 = vadd.f32 %v2381_v43, %v2380_v42 }
 0x4f4   : > { %v1626_v57 = vsel %vm1625_vm3, %v1616_v49, %v1624_v31  ;;  %v1551_v58 = vadd.f32 %v1550_v50, %v1549_v38  ;;  %v1436_v59 = vadd.f32 %v2382_v54, %v3404_v21  ;;  %v1499_v63 = vmax.f32 %v1433_v51, 0.0 }
 0x4f6   : > { %v1552_v61 = vrot.slane %v1551_v58, 2  ;;  %v1500_v55 = vmax.f32 %v1436_v59, 0.0  ;;  %v2383_v52 = vpop.f32.mrb[92].mxu0 }
 0x4f7   : > { %v2384_v56 = vpop.f32.mrb[93].mxu0 }
 0x4f8   : > { %v1553_v0 = vadd.f32 %v1552_v61, %v1551_v58  ;;  %v1556_v2 = vadd.f32 %v1500_v55, %v1499_v63  ;;  %v2385_v4 = vadd.f32 %v2384_v56, %v2383_v52  ;;  %v2386_v24 = vpop.f32.mrb[94].mxu0 }
 0x4f9   : > { %v2387_v11 = vpop.f32.mrb[95].mxu0 }
 0x4fa   : > { %v1554_v14 = vrot.slane %v1553_v0, 1  ;;  %v1441_v15 = vadd.f32 %v2385_v4, %v3404_v21  ;;  %v2388_v16 = vadd.f32 %v2387_v11, %v2386_v24 }
 0x4fc   : > { %v1555_v17 = vadd.f32 %v1554_v14, %v1553_v0  ;;  %v1501_v18 = vmax.f32 %v1441_v15, 0.0  ;;  %v1444_v19 = vadd.f32 %v2388_v16, %v3404_v21 }
 0x4fe   : > { %v1588_v20 = vmul.f32 0.03125, %v1555_v17  ;;  %v1557_v22 = vadd.f32 %v1556_v2, %v1501_v18  ;;  %v1502_v23 = vmax.f32 %v1444_v19, 0.0  ;;  %v2389_v25 = vpop.f32.mrb[96].mxu0 }
 0x4ff   : > { %v2390_v26 = vpop.f32.mrb[97].mxu0 }
 0x500   : > { %v1596_v27 = vpack.c.bf16 %v1588_v20, %v1588_v20  ;;  %v1558_v28 = vadd.f32 %v1557_v22, %v1502_v23  ;;  %v2391_v29 = vadd.f32 %v2390_v26, %v2389_v25  ;;  %v2392_v30 = vpop.f32.mrb[98].mxu0 }
 0x501   : > { %v2393_v31 = vpop.f32.mrb[99].mxu0 }
 0x502   : > { %v1617_v32 = vunpack.c.l.b16 %v1596_v27  ;;  %v1559_v33 = vrot.slane %v1558_v28, 4  ;;  %v1449_v34 = vadd.f32 %v2391_v29, %v3404_v21  ;;  %v2394_v36 = vadd.f32 %v2393_v31, %v2392_v30 }
 0x504   : > { %v1628_v37 = vsel %vm1627_vm4, %v1617_v32, %v1626_v57  ;;  %v1560_v40 = vadd.f32 %v1559_v33, %v1558_v28  ;;  %v1452_v41 = vadd.f32 %v2394_v36, %v3404_v21  ;;  %v1503_v45 = vmax.f32 %v1449_v34, 0.0 }
 0x506   : > { %v1561_v44 = vrot.slane %v1560_v40, 2  ;;  %v1504_v46 = vmax.f32 %v1452_v41, 0.0  ;;  %v2395_v47 = vpop.f32.mrb[100].mxu0 }
 0x507   : > { %v2396_v48 = vpop.f32.mrb[101].mxu0 }
 0x508   : > { %v1562_v60 = vadd.f32 %v1561_v44, %v1560_v40  ;;  %v1565_v62 = vadd.f32 %v1504_v46, %v1503_v45  ;;  %v2397_v1 = vadd.f32 %v2396_v48, %v2395_v47  ;;  %v2398_v3 = vpop.f32.mrb[102].mxu0 }
 0x509   : > { %v2399_v5 = vpop.f32.mrb[103].mxu0 }
 0x50a   : > { %v1563_v6 = vrot.slane %v1562_v60, 1  ;;  %v1457_v7 = vadd.f32 %v2397_v1, %v3404_v21  ;;  %v2400_v8 = vadd.f32 %v2399_v5, %v2398_v3  ;;  %v2770_v1 = vld [vmem:[#allocation7 + $0xdc] sm:$0xff]   ;;  %v2771_v3 = vld [vmem:[#allocation7 + $0xe4] sm:$0xff]   ;;  %v2772_v5 = vld [vmem:[#allocation7 + $0xec] sm:$0xff]  }
 0x50c   : > { %v1564_v9 = vadd.f32 %v1563_v6, %v1562_v60  ;;  %v1505_v10 = vmax.f32 %v1457_v7, 0.0  ;;  %v1460_v12 = vadd.f32 %v2400_v8, %v3404_v21  ;;  %v2773_v6 = vld [vmem:[#allocation7 + $0xf4] sm:$0xff]   ;;  %v2774_v7 = vld [vmem:[#allocation7 + $0xfc] sm:$0xff]   ;;  %v2775_v8 = vld [vmem:[#allocation7 + $0x104] sm:$0xff]  }
 0x50e   : > { %v1589_v35 = vmul.f32 0.03125, %v1564_v9  ;;  %v1566_v38 = vadd.f32 %v1565_v62, %v1505_v10  ;;  %v1506_v39 = vmax.f32 %v1460_v12, 0.0  ;;  %v2401_v42 = vpop.f32.mrb[104].mxu0  ;;  %v2769_v62 = vld [vmem:[#allocation7 + $0xd4] sm:$0xff]   ;;  %v358_v9 = vld [vmem:[#allocation7 + $0xc8] sm:$0x1] }
 0x50f   : > { %v2402_v43 = vpop.f32.mrb[105].mxu0  ;;  %v1600_v10 = vunpack.c.l.bf16 %v358_v9 }
 0x510   : > { %v1597_v49 = vpack.c.bf16 %v1589_v35, %v1589_v35  ;;  %v1567_v50 = vadd.f32 %v1566_v38, %v1506_v39  ;;  %v2403_v51 = vadd.f32 %v2402_v43, %v2401_v42  ;;  %v2404_v54 = vpop.f32.mrb[106].mxu0 }
 0x511   : > { %v2405_v57 = vpop.f32.mrb[107].mxu0  ;;  %v1604_v12 = vrot.slane %v1600_v10, %v3328_v53 }
 0x512   : > { %v1618_v58 = vunpack.c.l.b16 %v1597_v49  ;;  %v1568_v59 = vrot.slane %v1567_v50, 4  ;;  %v1465_v61 = vadd.f32 %v2403_v51, %v3404_v21  ;;  %v2406_v63 = vadd.f32 %v2405_v57, %v2404_v54  ;;  %v2777_v54 = vld [vmem:[#allocation7 + $0x118] sm:$0xff]   ;;  %v2778_v57 = vld [vmem:[#allocation7 + $0x120] sm:$0xff]  }
 0x514   : > { %v1569_v55 = vadd.f32 %v1568_v59, %v1567_v50  ;;  %v1468_v52 = vadd.f32 %v2406_v63, %v3404_v21  ;;  %v1630_v56 = vsel %vm1629_vm5, %v1618_v58, %v1628_v37  ;;  %v1507_v2 = vmax.f32 %v1465_v61, 0.0  ;;  %v2776_v50 = vld [vmem:[#allocation7 + $0x110] sm:$0xff]   ;;  %v2779_v58 = vld [vmem:[#allocation7 + $0x128] sm:$0xff]   ;;  %v2781_v61 = vld [vmem:[#allocation7 + $0x138] sm:$0xff]  }
 0x515   : > { %v2780_v59 = vld [vmem:[#allocation7 + $0x130] sm:$0xff]   ;;  %v2782_v63 = vld [vmem:[#allocation7 + $0x140] sm:$0xff]  }
 0x516   : > { %v1570_v0 = vrot.slane %v1569_v55, 2  ;;  %v1508_v4 = vmax.f32 %v1468_v52, 0.0  ;;  %v2407_v24 = vpop.f32.mrb[108].mxu0  ;;  %v375_v52 = vld [vmem:[#allocation7 + $0x10c] sm:$0x1] }
 0x517   : > { %v2408_v11 = vpop.f32.mrb[109].mxu0 }
 0x518   : > { %v1571_v14 = vadd.f32 %v1570_v0, %v1569_v55  ;;  %v1574_v15 = vadd.f32 %v1508_v4, %v1507_v2  ;;  %v2409_v16 = vadd.f32 %v2408_v11, %v2407_v24  ;;  %v2410_v17 = vpop.f32.mrb[110].mxu0  ;;  %v2783_v55 = vld [vmem:[#allocation7 + $0x148] sm:$0xff]  }
 0x519   : > { %v2411_v18 = vpop.f32.mrb[111].mxu0 }
 0x51a   : > { %v1572_v19 = vrot.slane %v1571_v14, 1  ;;  %v1473_v20 = vadd.f32 %v2409_v16, %v3404_v21  ;;  %v2412_v22 = vadd.f32 %v2411_v18, %v2410_v17  ;;  %v392_v17 = vld [vmem:[#allocation7 + $0x150] sm:$0x1] }
 0x51b   : > { %v1822_v18 = vunpack.c.l.bf16 %v392_v17 }
 0x51c   : > { %v1573_v23 = vadd.f32 %v1572_v19, %v1571_v14  ;;  %v1509_v25 = vmax.f32 %v1473_v20, 0.0  ;;  %v1476_v26 = vadd.f32 %v2412_v22, %v3404_v21  ;;  %v2768_v21 = vld [vmem:[#allocation7 + $0xcc] sm:$0xff]  }
 0x51e   : > { %v1590_v27 = vmul.f32 0.03125, %v1573_v23  ;;  %v1575_v28 = vadd.f32 %v1574_v15, %v1509_v25  ;;  %v1510_v29 = vmax.f32 %v1476_v26, 0.0 }
 0x520   : > { %v1598_v30 = vpack.c.bf16 %v1590_v27, %v1590_v27  ;;  %v1576_v31 = vadd.f32 %v1575_v28, %v1510_v29 }
 0x522   : > { %v1619_v32 = vunpack.c.l.b16 %v1598_v30  ;;  %v1577_v33 = vrot.slane %v1576_v31, 4 }
 0x524   : > { %v1578_v34 = vadd.f32 %v1577_v33, %v1576_v31  ;;  %v1632_v36 = vsel %vm1631_vm6, %v1619_v32, %v1630_v56  ;;  %v1727_v56 = vunpack.c.l.bf16 %v375_v52 }
 0x526   : > { %v1579_v37 = vrot.slane %v1578_v34, 2  ;;  %v1731_v0 = vrot.slane %v1727_v56, %v3328_v53 }
 0x528   : > { %v1580_v40 = vadd.f32 %v1579_v37, %v1578_v34 }
 0x52a   : > { %v1581_v41 = vrot.slane %v1580_v40, 1 }
 0x52c   : > { %v1582_v44 = vadd.f32 %v1581_v41, %v1580_v40 }
 0x52e   : > { %v1591_v45 = vmul.f32 0.03125, %v1582_v44 }
 0x530   : > { %v1599_v46 = vpack.c.bf16 %v1591_v45, %v1591_v45 }
 0x532   : > { %v1620_v47 = vunpack.c.l.b16 %v1599_v46 }
 0x534   : > { %v1634_v48 = vsel %vm1633_vm7, %v1620_v47, %v1632_v36 }
 0x535   : > { %v1635_v60 = vpack.c.b16 %v1634_v48, %v1634_v48 }
 0x537   : > { %2553 = vmatmul.mubr.bf16.vlgmr.msra.gmra.mrb[80].mxu1 %v1635_v60 }
 0x538   : > { %2557 = vmatpush3.bf16.msra.mxu1 %v2768_v21  ;;  %2572 = vmatprep.mubr.msk.bf16.mxu1 %vm2956_vm0, %v2955_v13 }
 0x539   : > { %2558 = vmatprep.subr.bf16.mxu1 %v2955_v13 }
 0x53c   : > { %2559 = vmatpush3.bf16.msra.mxu1 %v2769_v62 }
 0x53d   : > { %2560 = vmatprep.subr.bf16.mxu1 %v2955_v13 }
 0x540   : > { %2561 = vmatpush3.bf16.msra.mxu1 %v2770_v1 }
 0x541   : > { %2562 = vmatprep.subr.bf16.mxu1 %v2955_v13 }
 0x544   : > { %2563 = vmatpush3.bf16.msra.mxu1 %v2771_v3 }
 0x545   : > { %2564 = vmatprep.subr.bf16.mxu1 %v2955_v13 }
 0x548   : > { %2565 = vmatpush3.bf16.msra.mxu1 %v2772_v5 }
 0x549   : > { %2566 = vmatprep.subr.bf16.mxu1 %v2955_v13 }
 0x54c   : > { %2567 = vmatpush3.bf16.msra.mxu1 %v2773_v6 }
 0x54d   : > { %2568 = vmatprep.subr.bf16.mxu1 %v2955_v13 }
 0x550   : > { %2569 = vmatpush3.bf16.msra.mxu1 %v2774_v7 }
 0x551   : > { %2570 = vmatprep.subr.bf16.mxu1 %v2955_v13 }
 0x554   : > { %2571 = vmatpush3.bf16.msra.mxu1 %v2775_v8 }
 0x555   : > { %2576 = vmatprep.subr.bf16.mxu1 %v2955_v13 }
 0x60a   : > { %v1719_v35 = vpop.f32.mrb[80].mxu1 }
 0x60b   : > { %v1720_v38 = vadd.f32 %v1719_v35, %v1604_v12  ;;  %v2554_v39 = vpop.f32.mrb[81].mxu1 }
 0x60c   : > { %v1722_v42 = vpop.f32.mrb[82].mxu1 }
 0x60d   : > { %v1725_v43 = vmax.f32 %v1720_v38, 0.0  ;;  %v2555_v49 = vpop.f32.mrb[83].mxu1 }
 0x60f   : > { %v1726_v51 = vpack.c.bf16 %v1725_v43, %v1725_v43 }
 0x611   : > { %2573 = vmatmul.mubr.bf16.vlgmr.msra.gmra.mrb[84].mxu1 %v1726_v51 }
 0x612   : > { %2577 = vmatpush3.bf16.msra.mxu1 %v2776_v50  ;;  %2592 = vmatprep.mubr.msk.bf16.mxu1 %vm2956_vm0, %v2955_v13 }
 0x613   : > { %2578 = vmatprep.subr.bf16.mxu1 %v2955_v13 }
 0x616   : > { %2579 = vmatpush3.bf16.msra.mxu1 %v2777_v54 }
 0x617   : > { %2580 = vmatprep.subr.bf16.mxu1 %v2955_v13 }
 0x61a   : > { %2581 = vmatpush3.bf16.msra.mxu1 %v2778_v57 }
 0x61b   : > { %2582 = vmatprep.subr.bf16.mxu1 %v2955_v13 }
 0x61e   : > { %2583 = vmatpush3.bf16.msra.mxu1 %v2779_v58 }
 0x61f   : > { %2584 = vmatprep.subr.bf16.mxu1 %v2955_v13 }
 0x622   : > { %2585 = vmatpush3.bf16.msra.mxu1 %v2780_v59 }
 0x623   : > { %2586 = vmatprep.subr.bf16.mxu1 %v2955_v13 }
 0x626   : > { %2587 = vmatpush3.bf16.msra.mxu1 %v2781_v61 }
 0x627   : > { %2588 = vmatprep.subr.bf16.mxu1 %v2955_v13 }
 0x62a   : > { %2589 = vmatpush3.bf16.msra.mxu1 %v2782_v63 }
 0x62b   : > { %2590 = vmatprep.subr.bf16.mxu1 %v2955_v13  ;;  %v1826_v13 = vrot.slane %v1822_v18, %v3328_v53 }
 0x62e   : > { %2591 = vmatpush3.bf16.msra.mxu1 %v2783_v55 }
 0x6e4   : > { %v1814_v2 = vpop.f32.mrb[84].mxu1 }
 0x6e5   : > { %v1815_v4 = vadd.f32 %v1814_v2, %v1731_v0  ;;  %v2574_v24 = vpop.f32.mrb[85].mxu1 }
 0x6e6   : > { %v1817_v11 = vpop.f32.mrb[86].mxu1 }
 0x6e7   : > { %v1820_v14 = vmax.f32 %v1815_v4, 0.0  ;;  %v2575_v15 = vpop.f32.mrb[87].mxu1 }
 0x6e9   : > { %v1821_v16 = vpack.c.bf16 %v1820_v14, %v1820_v14 }
 0x6eb   : > { %2593 = vmatmul.mubr.bf16.vlgmr.msra.gmra.mrb[88].mxu1 %v1821_v16 }
 0x7be   : > { %v1909_v19 = vpop.f32.mrb[88].mxu1 }
 0x7bf   : > { %v1910_v20 = vadd.f32 %v1909_v19, %v1826_v13  ;;  %v2594_v22 = vpop.f32.mrb[89].mxu1 }
 0x7c0   : > { %v1912_v23 = vpop.f32.mrb[90].mxu1 }
 0x7c1   : > { %1915 = vst [vmem:[%s242_s30] sm:$0xff] %v1910_v20  ;;  %v2595_v25 = vpop.f32.mrb[91].mxu1 }
 0x7c2   : > { %2885 = shalt.err (!%p2882_p6)
}
 0x7c3   : > { %s2886_s25 = scalar_lea.hbm %s3470_s11, 128  ;;  %s2890_s26 = scalar_lea.hbm %s3517_s3, 256 }
 0x7c4   : > { %p2887_p8 = scmp.ne.s32.totalorder %s3470_s11, %s2886_s25  ;;  %p2891_p4 = scmp.lt.u32.totalorder %s3470_s11, %s3517_s3 }
 0x7c5   : > { %p2892_p11 = scmp.lt.u32.totalorder %s2890_s26, %s2886_s25  ;;  %p2894_p3 = scmp.lt.u32.totalorder %s2886_s25, %s3470_s11 }
 0x7c6   : > { %p2888_p10 = pnand %p2887_p8, %p3072_p12 }
 0x7c7   : > { %p2893_p13 = por %p2892_p11, %p2891_p4 }
 0x7c8   : > { %p2889_p0 = pneg %p2888_p10 }
 0x7c9   : > { %p2895_p7 = por %p2894_p3, %p2893_p13 }
 0x7cb   : > { %p2896_p9 = pnand %p2895_p7, %p2889_p0 }
 0x7cd   : > { %2899 = shalt.err (!%p2896_p9)
}
 0x7ce   : > { %2620 = dma.vmem_to_hbm [thread:$0]  (%p3072_p12), %s3472_s5, 128, %s3470_s11, %s1917_s27  }
 0x7cf PF: > { %s1942_s9 = sand.u32 1, %s2934_s12   ;;  %p3538_p1 = scmp.ne.s32.totalorder %s3525_s19, 0 }
 0x7d0   : > { %p3539_p5 = scmp.ge.s32.totalorder %s2946_s15, 2  ;;  %s1943_s4 = scalar_lea.sflag [#allocation4], %s1942_s9 }
 0x7d2   : > { %p2634_p2 = pnand %p3539_p5, %p3538_p1 }
 0x7d4   : > { %2929 = dma.done.wait (!%p2634_p2), %s1943_s4, 128  }
 0x7d5   : > { %2931 = vsyncadd (!%p2634_p2), %s1943_s4, 4294967168  ;;  %p19_p6 = scmp.ge.s32.totalorder %s3034_s24, 4   ;;  %s3540_s12 = smov %s2938_s13 }
 0x7d6   : > { %s3541_s13 = smov %s2942_s14  ;;  %s3542_s14 = smov %s3068_s17 }
 0x7d7   : > { %s3543_s15 = smov %s3034_s24  ;;  %21 = sbr.rel (!%p19_p6) target bundleno = 9 (0x9), region = 94 }
 0x7de   :  { %1948 = vsyncpa [#allocation3], 1 }
 0x7df   :  { %1950 = vsyncpa [#allocation3 + $0x1], 1 }
 0x7e0   :  { %1951 = vsyncpa [#allocation6], 1 }
 0x7e1   :  { %1953 = vsyncpa [#allocation6 + $0x1], 1 }
 0x7e2   :  { %1954 = vsyncpa [#allocation4], 1 }
 0x7e3   :  { %1956 = vsyncpa [#allocation4 + $0x1], 1 }

</bundles_post_ra>
